<compile_context>
chip_gen: v5e
topology: v5e:2x2
jax: 0.10.0
libtpu: 0.0.40
codegen_flags: <defaults>
</compile_context>

<pallas_src>
import functools

import jax
import jax.numpy as jnp
from jax.experimental import pallas as pl
from jax.experimental.pallas import tpu as pltpu


def _round_up(v, m):
    return ((v + m - 1) // m) * m


def _mlp_softmax_kernel(x_ref, w1_ref, b1_ref, w2_ref, b2_ref, o_ref):
    # hidden = relu(x @ W1 + b1)      (f32 MXU matmul, f32 accumulate)
    x = x_ref[...]                                                   # (TB, F)
    h = jnp.dot(x, w1_ref[...], preferred_element_type=jnp.float32)  # (TB, H)
    h = jnp.maximum(h + b1_ref[...], 0.0)

    # logits = h @ W2 + b2
    logits = jnp.dot(h, w2_ref[...], preferred_element_type=jnp.float32)
    logits = logits + b2_ref[...]                                    # (TB, O)

    # numerically-stable softmax over the last axis, exact normalization
    m = jnp.max(logits, axis=-1, keepdims=True)
    e = jnp.exp(logits - m)
    denom = jnp.sum(e, axis=-1, keepdims=True)
    o_ref[...] = (e / denom).astype(o_ref.dtype)


@functools.partial(jax.jit, static_argnames=("tb",))
def net_forward(x, w1, b1, w2, b2, tb=None):
    """x: (B, n_features); w1: (n_features, n_hiddens); b1: (1, n_hiddens);
    w2: (n_hiddens, n_outputs); b2: (1, n_outputs). Returns (B, n_outputs) f32."""
    B, F = x.shape
    H = w1.shape[1]
    O = w2.shape[1]

    # Batch tile: as large as practical (per-grid-step overhead ~0.35us), but
    # keep >=2 tiles when B allows so v7x megacore can shard the batch axis.
    if tb is None:
        if B <= 16:
            tb = _round_up(B, 8)
        else:
            tb = min(1024, _round_up((B + 1) // 2, 8))
    tb = max(8, _round_up(int(tb), 8))

    Bp = _round_up(B, tb)
    xp = x if Bp == B else jnp.zeros((Bp, F), x.dtype).at[:B].set(x)

    grid = (Bp // tb,)

    # VMEM budget: double-buffered x/out tiles + resident params + intermediates
    work_bytes = (2 * tb * F * 4
                  + 2 * tb * O * 4
                  + (F * H + H + H * O + O) * 4
                  + 6 * tb * max(H, O) * 4)
    vmem_limit = min(work_bytes + (4 << 20), 32 << 20)

    cost = pl.CostEstimate(
        flops=2 * Bp * (F * H + H * O),
        transcendentals=Bp * O,
        bytes_accessed=(Bp * F + Bp * O + F * H + H + H * O + O) * 4,
    )

    out = pl.pallas_call(
        _mlp_softmax_kernel,
        out_shape=jax.ShapeDtypeStruct((Bp, O), jnp.float32),
        grid_spec=pltpu.PrefetchScalarGridSpec(
            num_scalar_prefetch=0,
            grid=grid,
            in_specs=[
                pl.BlockSpec((tb, F), lambda i: (i, 0)),   # streamed x tiles
                pl.BlockSpec((F, H), lambda i: (0, 0)),    # params: VMEM-resident
                pl.BlockSpec((1, H), lambda i: (0, 0)),
                pl.BlockSpec((H, O), lambda i: (0, 0)),
                pl.BlockSpec((1, O), lambda i: (0, 0)),
            ],
            out_specs=pl.BlockSpec((tb, O), lambda i: (i, 0)),  # no lane padding
        ),
        compiler_params=pltpu.CompilerParams(
            dimension_semantics=("parallel",),
            vmem_limit_bytes=vmem_limit,
        ),
        cost_estimate=cost,
    )(xp, w1, b1, w2, b2)

    return out if Bp == B else out[:B]


def init_params(key, n_features, n_hiddens, n_outputs):
    """Deterministic init mimicking torch.nn.Linear's U(-1/sqrt(fan_in), 1/sqrt(fan_in))."""
    k1, k2, k3, k4 = jax.random.split(key, 4)
    lim1 = 1.0 / (n_features ** 0.5)
    lim2 = 1.0 / (n_hiddens ** 0.5)
    w1 = jax.random.uniform(k1, (n_features, n_hiddens), jnp.float32, -lim1, lim1)
    b1 = jax.random.uniform(k2, (1, n_hiddens), jnp.float32, -lim1, lim1)
    w2 = jax.random.uniform(k3, (n_hiddens, n_outputs), jnp.float32, -lim2, lim2)
    b2 = jax.random.uniform(k4, (1, n_outputs), jnp.float32, -lim2, lim2)
    return w1, b1, w2, b2


if __name__ == "__main__":
    n_features, n_hiddens, n_outputs = 16, 32, 8
    batch = 512   # -> two 256-row tiles (exercises the pipeline / megacore split)

    key = jax.random.PRNGKey(0)
    kx, kp = jax.random.split(key)
    x = jax.random.normal(kx, (batch, n_features), dtype=jnp.float32)
    w1, b1, w2, b2 = init_params(kp, n_features, n_hiddens, n_outputs)

    out = net_forward(x, w1, b1, w2, b2)
    out = jax.block_until_ready(out)

    # plain-JAX f32 reference (highest-precision matmuls)
    h_ref = jnp.maximum(
        jnp.dot(x, w1, precision=jax.lax.Precision.HIGHEST) + b1, 0.0)
    ref = jax.nn.softmax(
        jnp.dot(h_ref, w2, precision=jax.lax.Precision.HIGHEST) + b2, axis=-1)

    assert out.shape == (batch, n_outputs)
    assert bool(jnp.all(jnp.isfinite(out)))
    assert jnp.allclose(jnp.sum(out, axis=-1), 1.0, atol=1e-4), "rows must sum to 1"
    max_err = float(jnp.max(jnp.abs(out - ref)))
    assert jnp.allclose(out, ref, atol=5e-3, rtol=5e-3), max_err

    print("KERNEL_OK")
</pallas_src>

<mosaic_0001>
module attributes {stable_mosaic.version = 11 : i64} {
  func.func @_mlp_softmax_kernel(%arg0: i32, %arg1: memref<256x16xf32, #tpu.memory_space<vmem>>, %arg2: memref<16x32xf32, #tpu.memory_space<vmem>>, %arg3: memref<1x32xf32, #tpu.memory_space<vmem>>, %arg4: memref<32x8xf32, #tpu.memory_space<vmem>>, %arg5: memref<1x8xf32, #tpu.memory_space<vmem>>, %arg6: memref<256x8xf32, #tpu.memory_space<vmem>>) attributes {dimension_semantics = [#tpu.dimension_semantics<parallel>], iteration_bounds = array<i64: 2>, scalar_prefetch = 0 : i64, scratch_operands = 0 : i64, tpu.core_type = #tpu.core_type<tc>, window_params = [{transform_indices = @transform_0, window_bounds = array<i64: 256, 16>}, {pipeline_mode = #tpu.pipeline_mode<synchronous>, transform_indices = @transform_1, window_bounds = array<i64: 16, 32>}, {pipeline_mode = #tpu.pipeline_mode<synchronous>, transform_indices = @transform_2, window_bounds = array<i64: 1, 32>}, {pipeline_mode = #tpu.pipeline_mode<synchronous>, transform_indices = @transform_3, window_bounds = array<i64: 32, 8>}, {pipeline_mode = #tpu.pipeline_mode<synchronous>, transform_indices = @transform_4, window_bounds = array<i64: 1, 8>}, {transform_indices = @transform_5, window_bounds = array<i64: 256, 8>}]} {
    %c0 = arith.constant 0 : index
    %c0_0 = arith.constant 0 : index
    %0 = vector.load %arg1[%c0, %c0_0] : memref<256x16xf32, #tpu.memory_space<vmem>>, vector<256x16xf32>
    %c0_1 = arith.constant 0 : index
    %c0_2 = arith.constant 0 : index
    %1 = vector.load %arg2[%c0_1, %c0_2] : memref<16x32xf32, #tpu.memory_space<vmem>>, vector<16x32xf32>
    %cst = arith.constant dense<0.000000e+00> : vector<256x32xf32>
    %2 = tpu.matmul %0, %1, %cst {dimension_numbers = #tpu.dot_dimension_numbers<[1], [0], [0], [1], [0, 0, 1, 1], [], []>} : vector<256x16xf32>, vector<16x32xf32>, vector<256x32xf32> -> vector<256x32xf32>
    %c0_3 = arith.constant 0 : index
    %c0_4 = arith.constant 0 : index
    %3 = vector.load %arg3[%c0_3, %c0_4] : memref<1x32xf32, #tpu.memory_space<vmem>>, vector<1x32xf32>
    %4 = vector.broadcast %3 : vector<1x32xf32> to vector<256x32xf32>
    %5 = arith.addf %2, %4 : vector<256x32xf32>
    %cst_5 = arith.constant 0.000000e+00 : f32
    %6 = vector.broadcast %cst_5 : f32 to vector<256x32xf32>
    %7 = arith.maximumf %5, %6 : vector<256x32xf32>
    %c0_6 = arith.constant 0 : index
    %c0_7 = arith.constant 0 : index
    %8 = vector.load %arg4[%c0_6, %c0_7] : memref<32x8xf32, #tpu.memory_space<vmem>>, vector<32x8xf32>
    %cst_8 = arith.constant dense<0.000000e+00> : vector<256x8xf32>
    %9 = tpu.matmul %7, %8, %cst_8 {dimension_numbers = #tpu.dot_dimension_numbers<[1], [0], [0], [1], [0, 0, 1, 1], [], []>} : vector<256x32xf32>, vector<32x8xf32>, vector<256x8xf32> -> vector<256x8xf32>
    %c0_9 = arith.constant 0 : index
    %c0_10 = arith.constant 0 : index
    %10 = vector.load %arg5[%c0_9, %c0_10] : memref<1x8xf32, #tpu.memory_space<vmem>>, vector<1x8xf32>
    %11 = vector.broadcast %10 : vector<1x8xf32> to vector<256x8xf32>
    %12 = arith.addf %9, %11 : vector<256x8xf32>
    %cst_11 = arith.constant dense<0xFF800000> : vector<256xf32>
    %13 = vector.multi_reduction <maximumf>, %12, %cst_11 [1] : vector<256x8xf32> to vector<256xf32>
    %14 = vector.shape_cast %13 : vector<256xf32> to vector<256x1xf32>
    %15 = vector.broadcast %14 : vector<256x1xf32> to vector<256x8xf32>
    %16 = arith.subf %12, %15 : vector<256x8xf32>
    %17 = math.exp %16 : vector<256x8xf32>
    %cst_12 = arith.constant dense<0.000000e+00> : vector<256xf32>
    %18 = vector.multi_reduction <add>, %17, %cst_12 [1] : vector<256x8xf32> to vector<256xf32>
    %19 = vector.shape_cast %18 : vector<256xf32> to vector<256x1xf32>
    %20 = vector.broadcast %19 : vector<256x1xf32> to vector<256x8xf32>
    %21 = arith.divf %17, %20 : vector<256x8xf32>
    %c0_13 = arith.constant 0 : index
    %c0_14 = arith.constant 0 : index
    %22 = vector.load %arg6[%c0_13, %c0_14] : memref<256x8xf32, #tpu.memory_space<vmem>>, vector<256x8xf32>
    tpu.vector_store %arg6[%c0_13, %c0_14], %21 {strides = array<i32>} : memref<256x8xf32, #tpu.memory_space<vmem>>, vector<256x8xf32>,
    return
  }
  func.func @transform_0(%arg0: i32) -> (i32, i32) {
    %c0_i32 = arith.constant 0 : i32
    %c0_i32_0 = arith.constant 0 : i32
    return %arg0, %c0_i32 : i32, i32
  }
  func.func @transform_1(%arg0: i32) -> (i32, i32) {
    %c0_i32 = arith.constant 0 : i32
    %c0_i32_0 = arith.constant 0 : i32
    %c0_i32_1 = arith.constant 0 : i32
    return %c0_i32, %c0_i32_0 : i32, i32
  }
  func.func @transform_2(%arg0: i32) -> (i32, i32) {
    %c0_i32 = arith.constant 0 : i32
    %c0_i32_0 = arith.constant 0 : i32
    %c0_i32_1 = arith.constant 0 : i32
    return %c0_i32, %c0_i32_0 : i32, i32
  }
  func.func @transform_3(%arg0: i32) -> (i32, i32) {
    %c0_i32 = arith.constant 0 : i32
    %c0_i32_0 = arith.constant 0 : i32
    %c0_i32_1 = arith.constant 0 : i32
    return %c0_i32, %c0_i32_0 : i32, i32
  }
  func.func @transform_4(%arg0: i32) -> (i32, i32) {
    %c0_i32 = arith.constant 0 : i32
    %c0_i32_0 = arith.constant 0 : i32
    %c0_i32_1 = arith.constant 0 : i32
    return %c0_i32, %c0_i32_0 : i32, i32
  }
  func.func @transform_5(%arg0: i32) -> (i32, i32) {
    %c0_i32 = arith.constant 0 : i32
    %c0_i32_0 = arith.constant 0 : i32
    return %arg0, %c0_i32 : i32, i32
  }
}

</mosaic_0001>

<bundles_post_ra>
// kernel: net_forward.1
= control target key start
LH: loop header
LB: loop body
LE: loop exit
PB: predicated region body
PF: predicated region fallthrough
CT: control target
= control target key end

     0   :  { %s1840_s18 = smov 0   ;;  %s2454_s0 = inlined_call_operand.vmem [shape: f32[512,16], index: 0, kind: input, shape index: {}]   ;;  %s2455_s1 = inlined_call_operand.vmem [shape: f32[16,32], index: 1, kind: input, shape index: {}]   ;;  %s2456_s2 = inlined_call_operand.vmem [shape: f32[1,32], index: 2, kind: input, shape index: {}]   ;;  %s2457_s3 = inlined_call_operand.vmem [shape: f32[32,8], index: 3, kind: input, shape index: {}]   ;;  %s2458_s4 = inlined_call_operand.vmem [shape: f32[1,8], index: 4, kind: input, shape index: {}]   ;;  %s2459_s5 = inlined_call_operand.vmem [shape: f32[512,8], index: 5, kind: output, shape index: {}]  }
   0x1 LB: > { %s1583_s19 = sadd.s32 4294967295, %s1808_s18   ;;  %p1587_p0 = scmp.ge.s32.totalorder %s1808_s18, 1  ;;  %s1808_s18 = sphi %s1840_s18, %s15_s18  }
   0x2   : > { %p188_p1 = scmp.lt.s32.totalorder %s1808_s18, 3 }
   0x4   : > { %p189_p2 = pnand %p1587_p0, %p188_p1 }
   0x5   : > { %s1588_s24 = sshll.u32 (!%p189_p2), %s1583_s19, 5 }
   0x6   : > { %192 = sbr.rel (%p189_p2) target bundleno = 792 (0x318), region = 40  ;;  %p217_p3 = scmp.lt.s32.totalorder (!%p189_p2), %s1588_s24, 63 }
   0xb   : > { %v261_v0 = vld [vmem:[%s2455_s1 + $0x8] sm:$0xff]  ;;  %v260_v1 = vld [vmem:[%s2455_s1] sm:$0xff]  ;;  %s2461_s24 = smov (!%p217_p3, %s1588_s24), 63  ;;  %vm266_vm0 = vcmask 130048   ;;  %v511_v14 = vld [vmem:[%s2457_s3 + $0x18] sm:$0xff]  ;;  %vm516_vm1 = vcmask 261120  }
   0xc   : > { %377 = vmatpush.msra.mxu0 %v261_v0  ;;  %1658 = vmatpush.msra.mxu3 %v261_v0  ;;  %s1589_s25 = sshll.u32 %s2461_s24, 3  ;;  %v510_v15 = vld [vmem:[%s2457_s3 + $0x10] sm:$0xff]  ;;  %v509_v17 = vld [vmem:[%s2457_s3 + $0x8] sm:$0xff]  ;;  %v508_v18 = vld [vmem:[%s2457_s3] sm:$0xff]  ;;  %vm726_vm2 = vcmask 64512  }
   0xd   : > { %s1862_s28 = scalar_lea.vmem %s2454_s0, %s1589_s25  ;;  %625 = vmatpush.msra.mxu1 %v511_v14  ;;  %1660 = vmatpush.msra.mxu2 %v511_v14  ;;  %v1919_v26 = vld [vmem:[%s2456_s2] ss:$0 sm:$0xff]  ;;  %s2257_s19 = scalar_lea.vmem %s2459_s5, %s1589_s25 }
   0xe   : > { %378 = vmatpush.msra.mxu0 %v260_v1  ;;  %1659 = vmatpush.msra.mxu3 %v260_v1  ;;  %v228_v2 = vld [vmem:[%s1862_s28] sm:$0xff]  ;;  %v229_v3 = vld [vmem:[%s1862_s28 + $0x8] sm:$0xff]  ;;  %v230_v4 = vld [vmem:[%s1862_s28 + $0x10] sm:$0xff] }
   0xf   : > { %1592 = vmatmul.msk.f32.vlgmr.msra.gmra.mxu0 %vm266_vm0, %v228_v2  ;;  %v231_v5 = vld [vmem:[%s1862_s28 + $0x18] sm:$0xff]  ;;  %v232_v6 = vld [vmem:[%s1862_s28 + $0x20] sm:$0xff]  ;;  %v233_v7 = vld [vmem:[%s1862_s28 + $0x28] sm:$0xff]  ;;  %626 = vmatpush.msra.mxu1 %v510_v15 }
  0x10   : > { %v234_v8 = vld [vmem:[%s1862_s28 + $0x30] sm:$0xff]  ;;  %v235_v9 = vld [vmem:[%s1862_s28 + $0x38] sm:$0xff]  ;;  %v236_v10 = vld [vmem:[%s1862_s28 + $0x40] sm:$0xff]  ;;  %1661 = vmatpush.msra.mxu2 %v510_v15 }
  0x11   : > { %v237_v11 = vld [vmem:[%s1862_s28 + $0x48] sm:$0xff]  ;;  %v238_v12 = vld [vmem:[%s1862_s28 + $0x50] sm:$0xff]  ;;  %v239_v13 = vld [vmem:[%s1862_s28 + $0x58] sm:$0xff]  ;;  %627 = vmatpush.msra.mxu1 %v509_v17 }
  0x12   : > { %v240_v16 = vld [vmem:[%s1862_s28 + $0x60] sm:$0xff]  ;;  %1662 = vmatpush.msra.mxu2 %v509_v17  ;;  %v245_v19 = vld [vmem:[%s1862_s28 + $0x88] sm:$0xff]  ;;  %v246_v21 = vld [vmem:[%s1862_s28 + $0x90] sm:$0xff] }
  0x13   : > { %628 = vmatpush.msra.mxu1 %v508_v18  ;;  %1609 = vmatmul.msk.f32.vlgmr.msra.gmra.mxu3 %vm266_vm0, %v245_v19  ;;  %v241_v20 = vld [vmem:[%s1862_s28 + $0x68] sm:$0xff]  ;;  %v242_v22 = vld [vmem:[%s1862_s28 + $0x70] sm:$0xff]  ;;  %v247_v23 = vld [vmem:[%s1862_s28 + $0x98] sm:$0xff] }
  0x14   : > { %1663 = vmatpush.msra.mxu2 %v508_v18  ;;  %v243_v24 = vld [vmem:[%s1862_s28 + $0x78] sm:$0xff]  ;;  %v248_v25 = vld [vmem:[%s1862_s28 + $0xa0] sm:$0xff]  ;;  %v249_v31 = vld [vmem:[%s1862_s28 + $0xa8] sm:$0xff] }
  0x15   : > { %v244_v28 = vld [vmem:[%s1862_s28 + $0x80] sm:$0xff]  ;;  %v250_v35 = vld [vmem:[%s1862_s28 + $0xb0] sm:$0xff]  ;;  %v251_v39 = vld [vmem:[%s1862_s28 + $0xb8] sm:$0xff] }
  0x16   : > { %v252_v43 = vld [vmem:[%s1862_s28 + $0xc0] sm:$0xff]  ;;  %v253_v47 = vld [vmem:[%s1862_s28 + $0xc8] sm:$0xff]  ;;  %v254_v51 = vld [vmem:[%s1862_s28 + $0xd0] sm:$0xff] }
  0x17   : > { %1593 = vmatmul.msk.f32.gmra.mxu0 %vm266_vm0, %v229_v3  ;;  %v255_v55 = vld [vmem:[%s1862_s28 + $0xd8] sm:$0xff]  ;;  %v256_v59 = vld [vmem:[%s1862_s28 + $0xe0] sm:$0xff]  ;;  %v257_v63 = vld [vmem:[%s1862_s28 + $0xe8] sm:$0xff] }
  0x18   : > { %v258_v3 = vld [vmem:[%s1862_s28 + $0xf0] sm:$0xff] }
  0x1b   : > { %1610 = vmatmul.msk.f32.gmra.mxu3 %vm266_vm0, %v246_v21 }
  0x1f   : > { %1594 = vmatmul.msk.f32.gmra.mxu0 %vm266_vm0, %v230_v4 }
  0x23   : > { %1611 = vmatmul.msk.f32.gmra.mxu3 %vm266_vm0, %v247_v23 }
  0x27   : > { %1595 = vmatmul.msk.f32.gmra.mxu0 %vm266_vm0, %v231_v5 }
  0x2b   : > { %1612 = vmatmul.msk.f32.gmra.mxu3 %vm266_vm0, %v248_v25 }
  0x2f   : > { %1596 = vmatmul.msk.f32.gmra.mxu0 %vm266_vm0, %v232_v6 }
  0x33   : > { %1613 = vmatmul.msk.f32.gmra.mxu3 %vm266_vm0, %v249_v31 }
  0x37   : > { %1597 = vmatmul.msk.f32.gmra.mxu0 %vm266_vm0, %v233_v7  ;;  %v259_v7 = vld [vmem:[%s1862_s28 + $0xf8] sm:$0xff] }
  0x3b   : > { %1614 = vmatmul.msk.f32.gmra.mxu3 %vm266_vm0, %v250_v35 }
  0x3f   : > { %1598 = vmatmul.msk.f32.gmra.mxu0 %vm266_vm0, %v234_v8 }
  0x43   : > { %1615 = vmatmul.msk.f32.gmra.mxu3 %vm266_vm0, %v251_v39 }
  0x47   : > { %1599 = vmatmul.msk.f32.gmra.mxu0 %vm266_vm0, %v235_v9 }
  0x4b   : > { %1616 = vmatmul.msk.f32.gmra.mxu3 %vm266_vm0, %v252_v43 }
  0x4f   : > { %1600 = vmatmul.msk.f32.gmra.mxu0 %vm266_vm0, %v236_v10 }
  0x53   : > { %1617 = vmatmul.msk.f32.gmra.mxu3 %vm266_vm0, %v253_v47 }
  0x57   : > { %1601 = vmatmul.msk.f32.gmra.mxu0 %vm266_vm0, %v237_v11 }
  0x5b   : > { %1618 = vmatmul.msk.f32.gmra.mxu3 %vm266_vm0, %v254_v51 }
  0x5f   : > { %1602 = vmatmul.msk.f32.gmra.mxu0 %vm266_vm0, %v238_v12 }
  0x63   : > { %1619 = vmatmul.msk.f32.gmra.mxu3 %vm266_vm0, %v255_v55 }
  0x67   : > { %1603 = vmatmul.msk.f32.gmra.mxu0 %vm266_vm0, %v239_v13 }
  0x6b   : > { %1620 = vmatmul.msk.f32.gmra.mxu3 %vm266_vm0, %v256_v59 }
  0x6f   : > { %1604 = vmatmul.msk.f32.gmra.mxu0 %vm266_vm0, %v240_v16 }
  0x73   : > { %1621 = vmatmul.msk.f32.gmra.mxu3 %vm266_vm0, %v257_v63 }
  0x77   : > { %1605 = vmatmul.msk.f32.gmra.mxu0 %vm266_vm0, %v241_v20 }
  0x7b   : > { %1622 = vmatmul.msk.f32.gmra.mxu3 %vm266_vm0, %v258_v3 }
  0x7f   : > { %1606 = vmatmul.msk.f32.gmra.mxu0 %vm266_vm0, %v242_v22 }
  0x83   : > { %1623 = vmatmul.msk.f32.gmra.mxu3 %vm266_vm0, %v259_v7 }
  0x87   : > { %1607 = vmatmul.msk.f32.gmra.mxu0 %vm266_vm0, %v243_v24 }
  0x8c   : > { %v380_v27 = vpop.f32.mrf.mxu0 }
  0x8d   : > { %v381_v29 = vadd.f32 %v1919_v26, %v380_v27  ;;  %v1980_v27 = vld [vmem:[%s2458_s4] ss:$0 sm:$0xff] }
  0x8f   : > { %v476_v30 = vmax.f32 %v381_v29, 0.0  ;;  %1608 = vmatmul.msk.f32.gmra.mxu0 %vm266_vm0, %v244_v28 }
  0x91   : > { %1624 = vmatmul.msk.f32.vlgmr.msra.gmra.mxu1 %vm516_vm1, %v476_v30 }
  0x94   : > { %v383_v32 = vpop.f32.mrf.mxu0 }
  0x95   : > { %v384_v33 = vadd.f32 %v1919_v26, %v383_v32 }
  0x96   : > { %v431_v14 = vpop.f32.mrf.mxu3 }
  0x97   : > { %v477_v34 = vmax.f32 %v384_v33, 0.0  ;;  %v432_v35 = vadd.f32 %v1919_v26, %v431_v14 }
  0x99   : > { %1625 = vmatmul.msk.f32.gmra.mxu1 %vm516_vm1, %v477_v34 }
  0x9c   : > { %v386_v36 = vpop.f32.mrf.mxu0 }
  0x9d   : > { %v387_v37 = vadd.f32 %v1919_v26, %v386_v36  ;;  %v493_v36 = vmax.f32 %v432_v35, 0.0 }
  0x9e   : > { %v434_v19 = vpop.f32.mrf.mxu3 }
  0x9f   : > { %v478_v38 = vmax.f32 %v387_v37, 0.0 }
  0xa1   : > { %1626 = vmatmul.msk.f32.gmra.mxu1 %vm516_vm1, %v478_v38 }
  0xa4   : > { %v389_v40 = vpop.f32.mrf.mxu0 }
  0xa5   : > { %v390_v41 = vadd.f32 %v1919_v26, %v389_v40  ;;  %v435_v40 = vadd.f32 %v1919_v26, %v434_v19 }
  0xa6   : > { %v437_v24 = vpop.f32.mrf.mxu3 }
  0xa7   : > { %v479_v42 = vmax.f32 %v390_v41, 0.0 }
  0xa9   : > { %1627 = vmatmul.msk.f32.gmra.mxu1 %vm516_vm1, %v479_v42  ;;  %v494_v42 = vmax.f32 %v435_v40, 0.0 }
  0xac   : > { %v392_v44 = vpop.f32.mrf.mxu0 }
  0xad   : > { %v393_v45 = vadd.f32 %v1919_v26, %v392_v44 }
  0xae   : > { %v440_v33 = vpop.f32.mrf.mxu3 }
  0xaf   : > { %v480_v46 = vmax.f32 %v393_v45, 0.0 }
  0xb1   : > { %1628 = vmatmul.msk.f32.gmra.mxu1 %vm516_vm1, %v480_v46  ;;  %v438_v46 = vadd.f32 %v1919_v26, %v437_v24 }
  0xb4   : > { %v395_v48 = vpop.f32.mrf.mxu0 }
  0xb5   : > { %v396_v49 = vadd.f32 %v1919_v26, %v395_v48  ;;  %v495_v48 = vmax.f32 %v438_v46, 0.0 }
  0xb6   : > { %v443_v41 = vpop.f32.mrf.mxu3 }
  0xb7   : > { %v481_v50 = vmax.f32 %v396_v49, 0.0 }
  0xb9   : > { %1629 = vmatmul.msk.f32.gmra.mxu1 %vm516_vm1, %v481_v50 }
  0xbc   : > { %v398_v52 = vpop.f32.mrf.mxu0 }
  0xbd   : > { %v399_v53 = vadd.f32 %v1919_v26, %v398_v52  ;;  %v441_v52 = vadd.f32 %v1919_v26, %v440_v33 }
  0xbe   : > { %v446_v47 = vpop.f32.mrf.mxu3 }
  0xbf   : > { %v482_v54 = vmax.f32 %v399_v53, 0.0  ;;  %v496_v53 = vmax.f32 %v441_v52, 0.0 }
  0xc1   : > { %1630 = vmatmul.msk.f32.gmra.mxu1 %vm516_vm1, %v482_v54 }
  0xc4   : > { %v401_v56 = vpop.f32.mrf.mxu0 }
  0xc5   : > { %v402_v57 = vadd.f32 %v1919_v26, %v401_v56 }
  0xc6   : > { %v449_v55 = vpop.f32.mrf.mxu3 }
  0xc7   : > { %v483_v58 = vmax.f32 %v402_v57, 0.0 }
  0xc9   : > { %1631 = vmatmul.msk.f32.gmra.mxu1 %vm516_vm1, %v483_v58  ;;  %v444_v58 = vadd.f32 %v1919_v26, %v443_v41 }
  0xcb   : > { %v497_v59 = vmax.f32 %v444_v58, 0.0 }
  0xcc   : > { %v404_v60 = vpop.f32.mrf.mxu0 }
  0xcd   : > { %v405_v61 = vadd.f32 %v1919_v26, %v404_v60 }
  0xcf   : > { %v484_v62 = vmax.f32 %v405_v61, 0.0 }
  0xd1   : > { %1632 = vmatmul.msk.f32.gmra.mxu1 %vm516_vm1, %v484_v62  ;;  %v452_v62 = vpop.f32.mrf.mxu3 }
  0xd4   : > { %v407_v0 = vpop.f32.mrf.mxu0 }
  0xd5   : > { %v408_v1 = vadd.f32 %v1919_v26, %v407_v0  ;;  %v447_v0 = vadd.f32 %v1919_v26, %v446_v47 }
  0xd7   : > { %v485_v2 = vmax.f32 %v408_v1, 0.0  ;;  %v498_v1 = vmax.f32 %v447_v0, 0.0 }
  0xd9   : > { %1633 = vmatmul.msk.f32.gmra.mxu1 %vm516_vm1, %v485_v2 }
  0xdc   : > { %v410_v4 = vpop.f32.mrf.mxu0 }
  0xdd   : > { %v411_v5 = vadd.f32 %v1919_v26, %v410_v4 }
  0xdf   : > { %v486_v6 = vmax.f32 %v411_v5, 0.0  ;;  %v450_v5 = vadd.f32 %v1919_v26, %v449_v55 }
  0xe1   : > { %1634 = vmatmul.msk.f32.gmra.mxu1 %vm516_vm1, %v486_v6  ;;  %v455_v6 = vpop.f32.mrf.mxu3  ;;  %v499_v7 = vmax.f32 %v450_v5, 0.0 }
  0xe4   : > { %v413_v8 = vpop.f32.mrf.mxu0 }
  0xe5   : > { %v414_v9 = vadd.f32 %v1919_v26, %v413_v8 }
  0xe7   : > { %v487_v10 = vmax.f32 %v414_v9, 0.0 }
  0xe9   : > { %1635 = vmatmul.msk.f32.gmra.mxu1 %vm516_vm1, %v487_v10 }
  0xec   : > { %v416_v11 = vpop.f32.mrf.mxu0 }
  0xed   : > { %v417_v12 = vadd.f32 %v1919_v26, %v416_v11  ;;  %v453_v11 = vadd.f32 %v1919_v26, %v452_v62 }
  0xef   : > { %v488_v13 = vmax.f32 %v417_v12, 0.0  ;;  %v458_v12 = vpop.f32.mrf.mxu3 }
  0xf1   : > { %1636 = vmatmul.msk.f32.gmra.mxu1 %vm516_vm1, %v488_v13  ;;  %v500_v13 = vmax.f32 %v453_v11, 0.0 }
  0xf4   : > { %v419_v15 = vpop.f32.mrf.mxu0 }
  0xf5   : > { %v420_v16 = vadd.f32 %v1919_v26, %v419_v15 }
  0xf7   : > { %v489_v17 = vmax.f32 %v420_v16, 0.0 }
  0xf9   : > { %1637 = vmatmul.msk.f32.gmra.mxu1 %vm516_vm1, %v489_v17  ;;  %v456_v17 = vadd.f32 %v1919_v26, %v455_v6 }
  0xfc   : > { %v422_v18 = vpop.f32.mrf.mxu0 }
  0xfd   : > { %v423_v20 = vadd.f32 %v1919_v26, %v422_v18  ;;  %v501_v18 = vmax.f32 %v456_v17, 0.0 }
  0xff   : > { %v490_v21 = vmax.f32 %v423_v20, 0.0  ;;  %v461_v20 = vpop.f32.mrf.mxu3 }
 0x101   : > { %1638 = vmatmul.msk.f32.gmra.mxu1 %vm516_vm1, %v490_v21 }
 0x104   : > { %v425_v22 = vpop.f32.mrf.mxu0 }
 0x105   : > { %v426_v23 = vadd.f32 %v1919_v26, %v425_v22 }
 0x107   : > { %v491_v25 = vmax.f32 %v426_v23, 0.0  ;;  %v459_v23 = vadd.f32 %v1919_v26, %v458_v12 }
 0x109   : > { %1639 = vmatmul.msk.f32.gmra.mxu1 %vm516_vm1, %v491_v25  ;;  %v502_v24 = vmax.f32 %v459_v23, 0.0 }
 0x10c   : > { %v428_v28 = vpop.f32.mrf.mxu0 }
 0x10d   : > { %v429_v29 = vadd.f32 %v1919_v26, %v428_v28 }
 0x10e   : > { %v630_v30 = vpop.f32.mrf.mxu1 }
 0x10f   : > { %v492_v31 = vmax.f32 %v429_v29, 0.0  ;;  %v1984_v32 = vadd.f32 %v1980_v27, %v630_v30  ;;  %v464_v29 = vpop.f32.mrf.mxu3 }
 0x111   : > { %1640 = vmatmul.msk.f32.vlgmr.msra.gmra.mxu2 %vm516_vm1, %v492_v31  ;;  %v727_v34 = vsel %vm726_vm2, %v1984_v32, -inf  ;;  %v462_v31 = vadd.f32 %v1919_v26, %v461_v20 }
 0x112   : > { %728 = vmax.xlane.f32.xlu0 %v727_v34 }
 0x113   : > { %v503_v33 = vmax.f32 %v462_v31, 0.0 }
 0x116   : > { %v633_v37 = vpop.f32.mrf.mxu1 }
 0x117   : > { %v1991_v38 = vadd.f32 %v1980_v27, %v633_v37  ;;  %v465_v37 = vadd.f32 %v1919_v26, %v464_v29 }
 0x119   : > { %1641 = vmatmul.msk.f32.gmra.mxu2 %vm516_vm1, %v493_v36  ;;  %v730_v39 = vsel %vm726_vm2, %v1991_v38, -inf  ;;  %v504_v40 = vmax.f32 %v465_v37, 0.0 }
 0x11a   : > { %731 = vmax.xlane.f32.xlu0 %v730_v39  ;;  %v467_v39 = vpop.f32.mrf.mxu3 }
 0x11e   : > { %v636_v43 = vpop.f32.mrf.mxu1 }
 0x11f   : > { %v1998_v44 = vadd.f32 %v1980_v27, %v636_v43 }
 0x121   : > { %1642 = vmatmul.msk.f32.gmra.mxu2 %vm516_vm1, %v494_v42  ;;  %v733_v45 = vsel %vm726_vm2, %v1998_v44, -inf }
 0x122   : > { %734 = vmax.xlane.f32.xlu1 %v733_v45  ;;  %v468_v45 = vadd.f32 %v1919_v26, %v467_v39  ;;  %v470_v46 = vpop.f32.mrf.mxu3 }
 0x123   : > { %v471_v52 = vadd.f32 %v1919_v26, %v470_v46 }
 0x124   : > { %v505_v47 = vmax.f32 %v468_v45, 0.0 }
 0x126   : > { %v639_v49 = vpop.f32.mrf.mxu1 }
 0x127   : > { %v2005_v50 = vadd.f32 %v1980_v27, %v639_v49 }
 0x129   : > { %1643 = vmatmul.msk.f32.gmra.mxu2 %vm516_vm1, %v495_v48  ;;  %v736_v51 = vsel %vm726_vm2, %v2005_v50, -inf }
 0x12a   : > { %737 = vmax.xlane.f32.xlu1 %v736_v51  ;;  %v473_v55 = vpop.f32.mrf.mxu3 }
 0x12e   : > { %v642_v54 = vpop.f32.mrf.mxu1 }
 0x12f   : > { %v2012_v56 = vadd.f32 %v1980_v27, %v642_v54 }
 0x131   : > { %1644 = vmatmul.msk.f32.gmra.mxu2 %vm516_vm1, %v496_v53  ;;  %v739_v57 = vsel %vm726_vm2, %v2012_v56, -inf  ;;  %v506_v53 = vmax.f32 %v471_v52, 0.0 }
 0x132   : > { %740 = vmax.xlane.f32.xlu2 %v739_v57 }
 0x136   : > { %v645_v60 = vpop.f32.mrf.mxu1 }
 0x137   : > { %v2019_v61 = vadd.f32 %v1980_v27, %v645_v60 }
 0x139   : > { %1645 = vmatmul.msk.f32.gmra.mxu2 %vm516_vm1, %v497_v59  ;;  %v742_v63 = vsel %vm726_vm2, %v2019_v61, -inf  ;;  %v474_v59 = vadd.f32 %v1919_v26, %v473_v55 }
 0x13a   : > { %743 = vmax.xlane.f32.xlu2 %v742_v63 }
 0x13b   : > { %v507_v60 = vmax.f32 %v474_v59, 0.0 }
 0x13e   : > { %v648_v2 = vpop.f32.mrf.mxu1 }
 0x13f   : > { %v2026_v3 = vadd.f32 %v1980_v27, %v648_v2 }
 0x141   : > { %1646 = vmatmul.msk.f32.gmra.mxu2 %vm516_vm1, %v498_v1  ;;  %v745_v4 = vsel %vm726_vm2, %v2026_v3, -inf }
 0x142   : > { %746 = vmax.xlane.f32.xlu0 %v745_v4 }
 0x146   : > { %v651_v8 = vpop.f32.mrf.mxu1 }
 0x147   : > { %v2033_v9 = vadd.f32 %v1980_v27, %v651_v8 }
 0x149   : > { %1647 = vmatmul.msk.f32.gmra.mxu2 %vm516_vm1, %v499_v7  ;;  %v748_v10 = vsel %vm726_vm2, %v2033_v9, -inf }
 0x14a   : > { %749 = vmax.xlane.f32.xlu1 %v748_v10 }
 0x14e   : > { %v654_v14 = vpop.f32.mrf.mxu1 }
 0x14f   : > { %v2040_v15 = vadd.f32 %v1980_v27, %v654_v14 }
 0x151   : > { %1648 = vmatmul.msk.f32.gmra.mxu2 %vm516_vm1, %v500_v13  ;;  %v751_v16 = vsel %vm726_vm2, %v2040_v15, -inf }
 0x152   : > { %752 = vmax.xlane.f32.xlu2 %v751_v16 }
 0x156   : > { %v657_v19 = vpop.f32.mrf.mxu1 }
 0x157   : > { %v2047_v21 = vadd.f32 %v1980_v27, %v657_v19 }
 0x159   : > { %1649 = vmatmul.msk.f32.gmra.mxu2 %vm516_vm1, %v501_v18  ;;  %v754_v22 = vsel %vm726_vm2, %v2047_v21, -inf }
 0x15a   : > { %755 = vmax.xlane.f32.xlu0 %v754_v22 }
 0x15e   : > { %v660_v25 = vpop.f32.mrf.mxu1 }
 0x15f   : > { %v2054_v28 = vadd.f32 %v1980_v27, %v660_v25 }
 0x161   : > { %1650 = vmatmul.msk.f32.gmra.mxu2 %vm516_vm1, %v502_v24  ;;  %v757_v30 = vsel %vm726_vm2, %v2054_v28, -inf }
 0x162   : > { %758 = vmax.xlane.f32.xlu1 %v757_v30 }
 0x166   : > { %v663_v34 = vpop.f32.mrf.mxu1 }
 0x167   : > { %v2061_v35 = vadd.f32 %v1980_v27, %v663_v34 }
 0x169   : > { %1651 = vmatmul.msk.f32.gmra.mxu2 %vm516_vm1, %v503_v33  ;;  %v760_v36 = vsel %vm726_vm2, %v2061_v35, -inf }
 0x16a   : > { %761 = vmax.xlane.f32.xlu2 %v760_v36 }
 0x16e   : > { %v666_v41 = vpop.f32.mrf.mxu1 }
 0x16f   : > { %v2068_v42 = vadd.f32 %v1980_v27, %v666_v41 }
 0x171   : > { %1652 = vmatmul.msk.f32.gmra.mxu2 %vm516_vm1, %v504_v40  ;;  %v763_v43 = vsel %vm726_vm2, %v2068_v42, -inf }
 0x172   : > { %764 = vmax.xlane.f32.xlu0 %v763_v43 }
 0x176   : > { %v669_v48 = vpop.f32.mrf.mxu1 }
 0x177   : > { %v2075_v49 = vadd.f32 %v1980_v27, %v669_v48 }
 0x179   : > { %1653 = vmatmul.msk.f32.gmra.mxu2 %vm516_vm1, %v505_v47  ;;  %v766_v51 = vsel %vm726_vm2, %v2075_v49, -inf }
 0x17a   : > { %767 = vmax.xlane.f32.xlu1 %v766_v51 }
 0x17e   : > { %v672_v54 = vpop.f32.mrf.mxu1 }
 0x17f   : > { %v2082_v57 = vadd.f32 %v1980_v27, %v672_v54 }
 0x181   : > { %1654 = vmatmul.msk.f32.gmra.mxu2 %vm516_vm1, %v506_v53  ;;  %v769_v58 = vsel %vm726_vm2, %v2082_v57, -inf }
 0x182   : > { %770 = vmax.xlane.f32.xlu2 %v769_v58 }
 0x185   : > { %v729_v62 = vpop.xlane.xlu0 %728 }
 0x186   : > { %v823_v63 = vsub.f32 %v1984_v32, %v729_v62  ;;  %v675_v0 = vpop.f32.mrf.mxu1 }
 0x187   : > { %v2090_v1 = vadd.f32 %v1980_v27, %v675_v0 }
 0x188   : > { %v855_v2 = vmul.f32 1.442695, %v823_v63 }
 0x189   : > { %1655 = vmatmul.msk.f32.gmra.mxu2 %vm516_vm1, %v507_v60  ;;  %v772_v4 = vsel %vm726_vm2, %v2090_v1, -inf }
 0x18a   : > { %1674 = vpow2.f32 %v855_v2  ;;  %773 = vmax.xlane.f32.xlu0 %v772_v4 }
 0x18d   : > { %v732_v5 = vpop.xlane.xlu0 %731 }
 0x18e   : > { %v824_v26 = vsub.f32 %v1991_v38, %v732_v5 }
 0x190   : > { %v2096_v6 = vpop.eup %1674  ;;  %v857_v7 = vmul.f32 1.442695, %v824_v26 }
 0x191   : > { %v919_v32 = vsel %vm726_vm2, %v2096_v6, 0.0 }
 0x192   : > { %1676 = vpow2.f32 %v857_v7  ;;  %920 = vadd.xlane.f32.xlu2 %v919_v32 }
 0x194   : > { %v678_v8 = vpop.f32.mrf.mxu2 }
 0x195   : > { %v2101_v10 = vadd.f32 %v1980_v27, %v678_v8  ;;  %v735_v11 = vpop.xlane.xlu1 %734 }
 0x196   : > { %v825_v12 = vsub.f32 %v1998_v44, %v735_v11 }
 0x197   : > { %v775_v13 = vsel %vm726_vm2, %v2101_v10, -inf }
 0x198   : > { %v2106_v14 = vpop.eup %1676  ;;  %v859_v38 = vmul.f32 1.442695, %v825_v12  ;;  %776 = vmax.xlane.f32.xlu1 %v775_v13 }
 0x199   : > { %v922_v16 = vsel %vm726_vm2, %v2106_v14, 0.0 }
 0x19a   : > { %1678 = vpow2.f32 %v859_v38  ;;  %923 = vadd.xlane.f32.xlu0 %v922_v16 }
 0x19c   : > { %v681_v17 = vpop.f32.mrf.mxu2 }
 0x19d   : > { %v2111_v18 = vadd.f32 %v1980_v27, %v681_v17  ;;  %v738_v19 = vpop.xlane.xlu1 %737 }
 0x19e   : > { %v826_v20 = vsub.f32 %v2005_v50, %v738_v19 }
 0x19f   : > { %v778_v44 = vsel %vm726_vm2, %v2111_v18, -inf }
 0x1a0   : > { %v2116_v22 = vpop.eup %1678  ;;  %v861_v23 = vmul.f32 1.442695, %v826_v20  ;;  %779 = vmax.xlane.f32.xlu2 %v778_v44 }
 0x1a1   : > { %v925_v24 = vsel %vm726_vm2, %v2116_v22, 0.0 }
 0x1a2   : > { %1680 = vpow2.f32 %v861_v23  ;;  %926 = vadd.xlane.f32.xlu1 %v925_v24 }
 0x1a4   : > { %v684_v25 = vpop.f32.mrf.mxu2 }
 0x1a5   : > { %v2121_v29 = vadd.f32 %v1980_v27, %v684_v25  ;;  %v741_v30 = vpop.xlane.xlu2 %740 }
 0x1a6   : > { %v827_v31 = vsub.f32 %v2012_v56, %v741_v30 }
 0x1a7   : > { %v781_v50 = vsel %vm726_vm2, %v2121_v29, -inf }
 0x1a8   : > { %v2126_v33 = vpop.eup %1680  ;;  %v863_v34 = vmul.f32 1.442695, %v827_v31  ;;  %782 = vmax.xlane.f32.xlu0 %v781_v50 }
 0x1a9   : > { %v928_v36 = vsel %vm726_vm2, %v2126_v33, 0.0 }
 0x1aa   : > { %1682 = vpow2.f32 %v863_v34  ;;  %929 = vadd.xlane.f32.xlu2 %v928_v36 }
 0x1ac   : > { %v687_v37 = vpop.f32.mrf.mxu2 }
 0x1ad   : > { %v2131_v39 = vadd.f32 %v1980_v27, %v687_v37  ;;  %v744_v40 = vpop.xlane.xlu2 %743 }
 0x1ae   : > { %v828_v41 = vsub.f32 %v2019_v61, %v744_v40 }
 0x1af   : > { %v784_v56 = vsel %vm726_vm2, %v2131_v39, -inf }
 0x1b0   : > { %v2136_v43 = vpop.eup %1682  ;;  %v865_v45 = vmul.f32 1.442695, %v828_v41  ;;  %785 = vmax.xlane.f32.xlu1 %v784_v56 }
 0x1b1   : > { %v931_v46 = vsel %vm726_vm2, %v2136_v43, 0.0 }
 0x1b2   : > { %1684 = vpow2.f32 %v865_v45  ;;  %932 = vadd.xlane.f32.xlu0 %v931_v46 }
 0x1b4   : > { %v690_v47 = vpop.f32.mrf.mxu2 }
 0x1b5   : > { %v2141_v48 = vadd.f32 %v1980_v27, %v690_v47  ;;  %v747_v51 = vpop.xlane.xlu0 %746 }
 0x1b6   : > { %v829_v52 = vsub.f32 %v2026_v3, %v747_v51 }
 0x1b7   : > { %v787_v61 = vsel %vm726_vm2, %v2141_v48, -inf }
 0x1b8   : > { %v2146_v53 = vpop.eup %1684  ;;  %v867_v54 = vmul.f32 1.442695, %v829_v52  ;;  %788 = vmax.xlane.f32.xlu2 %v787_v61 }
 0x1b9   : > { %v934_v55 = vsel %vm726_vm2, %v2146_v53, 0.0 }
 0x1ba   : > { %1686 = vpow2.f32 %v867_v54  ;;  %935 = vadd.xlane.f32.xlu1 %v934_v55 }
 0x1bc   : > { %v693_v58 = vpop.f32.mrf.mxu2 }
 0x1bd   : > { %v2151_v59 = vadd.f32 %v1980_v27, %v693_v58  ;;  %v750_v60 = vpop.xlane.xlu1 %749 }
 0x1be   : > { %v830_v62 = vsub.f32 %v2033_v9, %v750_v60 }
 0x1bf   : > { %v790_v3 = vsel %vm726_vm2, %v2151_v59, -inf }
 0x1c0   : > { %v2156_v63 = vpop.eup %1686  ;;  %v869_v0 = vmul.f32 1.442695, %v830_v62  ;;  %791 = vmax.xlane.f32.xlu0 %v790_v3 }
 0x1c1   : > { %v937_v2 = vsel %vm726_vm2, %v2156_v63, 0.0 }
 0x1c2   : > { %1688 = vpow2.f32 %v869_v0  ;;  %938 = vadd.xlane.f32.xlu2 %v937_v2 }
 0x1c4   : > { %v696_v4 = vpop.f32.mrf.mxu2 }
 0x1c5   : > { %v2161_v5 = vadd.f32 %v1980_v27, %v696_v4  ;;  %v753_v26 = vpop.xlane.xlu2 %752 }
 0x1c6   : > { %v831_v7 = vsub.f32 %v2040_v15, %v753_v26 }
 0x1c7   : > { %v793_v9 = vsel %vm726_vm2, %v2161_v5, -inf }
 0x1c8   : > { %v2166_v32 = vpop.eup %1688  ;;  %v871_v8 = vmul.f32 1.442695, %v831_v7  ;;  %794 = vmax.xlane.f32.xlu1 %v793_v9 }
 0x1c9   : > { %v940_v11 = vsel %vm726_vm2, %v2166_v32, 0.0 }
 0x1ca   : > { %1690 = vpow2.f32 %v871_v8  ;;  %941 = vadd.xlane.f32.xlu0 %v940_v11 }
 0x1cc   : > { %v699_v12 = vpop.f32.mrf.mxu2 }
 0x1cd   : > { %v2171_v13 = vadd.f32 %v1980_v27, %v699_v12  ;;  %v756_v38 = vpop.xlane.xlu0 %755 }
 0x1ce   : > { %v832_v16 = vsub.f32 %v2047_v21, %v756_v38 }
 0x1cf   : > { %v796_v15 = vsel %vm726_vm2, %v2171_v13, -inf }
 0x1d0   : > { %v2176_v17 = vpop.eup %1690  ;;  %v873_v19 = vmul.f32 1.442695, %v832_v16  ;;  %797 = vmax.xlane.f32.xlu2 %v796_v15 }
 0x1d1   : > { %v943_v20 = vsel %vm726_vm2, %v2176_v17, 0.0 }
 0x1d2   : > { %1692 = vpow2.f32 %v873_v19  ;;  %944 = vadd.xlane.f32.xlu1 %v943_v20 }
 0x1d4   : > { %v702_v44 = vpop.f32.mrf.mxu2 }
 0x1d5   : > { %v2181_v23 = vadd.f32 %v1980_v27, %v702_v44  ;;  %v759_v24 = vpop.xlane.xlu1 %758 }
 0x1d6   : > { %v833_v25 = vsub.f32 %v2054_v28, %v759_v24 }
 0x1d7   : > { %v799_v21 = vsel %vm726_vm2, %v2181_v23, -inf }
 0x1d8   : > { %v2186_v30 = vpop.eup %1692  ;;  %v875_v31 = vmul.f32 1.442695, %v833_v25  ;;  %800 = vmax.xlane.f32.xlu0 %v799_v21 }
 0x1d9   : > { %v946_v50 = vsel %vm726_vm2, %v2186_v30, 0.0 }
 0x1da   : > { %1694 = vpow2.f32 %v875_v31  ;;  %947 = vadd.xlane.f32.xlu2 %v946_v50 }
 0x1dc   : > { %v705_v34 = vpop.f32.mrf.mxu2 }
 0x1dd   : > { %v2191_v36 = vadd.f32 %v1980_v27, %v705_v34  ;;  %v762_v54 = vpop.xlane.xlu2 %761 }
 0x1de   : > { %v834_v16 = vsub.f32 %v2061_v35, %v762_v54 }
 0x1df   : > { %v802_v37 = vsel %vm726_vm2, %v2191_v36, -inf }
 0x1e0   : > { %v2195_v28 = vpop.eup %1694  ;;  %803 = vmax.xlane.f32.xlu1 %v802_v37  ;;  %v877_v20 = vmul.f32 1.442695, %v834_v16 }
 0x1e1   : > { %v949_v40 = vsel %vm726_vm2, %v2195_v28, 0.0 }
 0x1e2   : > { %950 = vadd.xlane.f32.xlu0 %v949_v40 }
 0x1e4   : > { %v708_v41 = vpop.f32.mrf.mxu2 }
 0x1e5   : > { %v2200_v56 = vadd.f32 %v1980_v27, %v708_v41  ;;  %v765_v52 = vpop.xlane.xlu0 %764 }
 0x1e6   : > { %v835_v58 = vsub.f32 %v2068_v42, %v765_v52 }
 0x1e7   : > { %v805_v45 = vsel %vm726_vm2, %v2200_v56, -inf }
 0x1e8   : > { %806 = vmax.xlane.f32.xlu2 %v805_v45  ;;  %v879_v62 = vmul.f32 1.442695, %v835_v58 }
 0x1ea   : > { %1696 = vpow2.f32 %v879_v62 }
 0x1ec   : > { %v711_v46 = vpop.f32.mrf.mxu2 }
 0x1ed   : > { %v2205_v47 = vadd.f32 %v1980_v27, %v711_v46  ;;  %v768_v3 = vpop.xlane.xlu1 %767 }
 0x1ee   : > { %v836_v2 = vsub.f32 %v2075_v49, %v768_v3 }
 0x1ef   : > { %v808_v51 = vsel %vm726_vm2, %v2205_v47, -inf }
 0x1f0   : > { %809 = vmax.xlane.f32.xlu0 %v808_v51  ;;  %v881_v8 = vmul.f32 1.442695, %v836_v2  ;;  %v2222_v12 = vpop.eup %1696 }
 0x1f1   : > { %v955_v19 = vsel %vm726_vm2, %v2222_v12, 0.0 }
 0x1f2   : > { %1698 = vpow2.f32 %v881_v8 }
 0x1f4   : > { %v714_v61 = vpop.f32.mrf.mxu2 }
 0x1f5   : > { %v2210_v55 = vadd.f32 %v1980_v27, %v714_v61  ;;  %v771_v4 = vpop.xlane.xlu2 %770 }
 0x1f6   : > { %v837_v25 = vsub.f32 %v2082_v57, %v771_v4 }
 0x1f7   : > { %v811_v60 = vsel %vm726_vm2, %v2210_v55, -inf }
 0x1f8   : > { %812 = vmax.xlane.f32.xlu1 %v811_v60  ;;  %v2232_v44 = vpop.eup %1698  ;;  %v883_v51 = vmul.f32 1.442695, %v837_v25 }
 0x1f9   : > { %v958_v57 = vsel %vm726_vm2, %v2232_v44, 0.0 }
 0x1fc   : > { %v717_v0 = vpop.f32.mrf.mxu2 }
 0x1fd   : > { %v2217_v26 = vadd.f32 %v1980_v27, %v717_v0  ;;  %v774_v7 = vpop.xlane.xlu0 %773 }
 0x1fe   : > { %v838_v9 = vsub.f32 %v2090_v1, %v774_v7 }
 0x1ff   : > { %v814_v42 = vsel %vm726_vm2, %v2217_v26, -inf }
 0x200   : > { %815 = vmax.xlane.f32.xlu2 %v814_v42  ;;  %v885_v11 = vmul.f32 1.442695, %v838_v9 }
 0x204   : > { %v720_v38 = vpop.f32.mrf.mxu2 }
 0x205   : > { %v2226_v49 = vadd.f32 %v1980_v27, %v720_v38  ;;  %v921_v15 = vpop.xlane.xlu2 %920 }
 0x206   : > { %1700 = vrcp.f32 %v921_v15  ;;  %v1024_v61 = vand.u32 2147483647, %v921_v15  ;;  %vm1020_vm4 = vweird.f32 %v921_v15 }
 0x207   : > { %1702 = vpow2.f32 %v885_v11  ;;  %v817_v1 = vsel %vm726_vm2, %v2226_v49, -inf }
 0x208   : > { %818 = vmax.xlane.f32.xlu0 %v817_v1  ;;  %956 = vadd.xlane.f32.xlu2 %v955_v19  ;;  %1704 = vpow2.f32 %v877_v20  ;;  %vm1025_vm6 = vcmp.eq.f32.partialorder %v1024_v61, 8.507059e+37 }
 0x20b   : > { %v777_v24 = vpop.xlane.xlu1 %776 }
 0x20c   : > { %v1701_v35 = vpop.eup %1700  ;;  %v839_v21 = vsub.f32 %v2101_v10, %v777_v24  ;;  %v723_v31 = vpop.f32.mrf.mxu2  ;;  %v1026_v10 = vand.u32 2147483648, %v921_v15 }
 0x20d   : > { %v2236_v50 = vpop.eup %1702  ;;  %v1016_v34 = vmul.f32 %v1701_v35, %v921_v15  ;;  %v2239_v37 = vadd.f32 %v1980_v27, %v723_v31  ;;  %v924_v40 = vpop.xlane.xlu0 %923  ;;  %vm1021_vm3 = vweird.f32 %v1701_v35 }
 0x20e   : > { %v887_v41 = vmul.f32 1.442695, %v839_v21  ;;  %1706 = vrcp.f32 %v924_v40  ;;  %v964_v52 = vsel %vm726_vm2, %v2236_v50, 0.0  ;;  %v2247_v54 = vpop.eup %1704  ;;  %vm1022_vm5 = vmor %vm1020_vm4, %vm1021_vm3  ;;  %v1027_v3 = vor.u32 1.1754944e-38, %v1026_v10 }
 0x20f   : > { %v1017_v45 = vsub.f32 1.0, %v1016_v34  ;;  %v820_v46 = vsel %vm726_vm2, %v2239_v37, -inf  ;;  %v952_v38 = vsel %vm726_vm2, %v2247_v54, 0.0  ;;  %v1041_v16 = vand.u32 2147483648, %v924_v40 }
 0x210   : > { %1708 = vpow2.f32 %v887_v41  ;;  %821 = vmax.xlane.f32.xlu1 %v820_v46  ;;  %959 = vadd.xlane.f32.xlu0 %v958_v57  ;;  %v1039_v1 = vand.u32 2147483647, %v924_v40  ;;  %vm1035_vm8 = vweird.f32 %v924_v40 }
 0x211   : > { %v1018_v27 = vmul.f32 %v1701_v35, %v1017_v45  ;;  %965 = vadd.xlane.f32.xlu2 %v964_v52  ;;  %1710 = vpow2.f32 %v883_v51  ;;  %v1042_v25 = vor.u32 1.1754944e-38, %v1041_v16 }
 0x212   : > { %vm1040_vm10 = vcmp.eq.f32.partialorder %v1039_v1, 8.507059e+37 }
 0x213   : > { %v1019_v58 = vadd.f32 %v1701_v35, %v1018_v27  ;;  %v780_v60 = vpop.xlane.xlu2 %779 }
 0x214   : > { %v1707_v62 = vpop.eup %1706  ;;  %v840_v4 = vsub.f32 %v2111_v18, %v780_v60 }
 0x215   : > { %v1023_v0 = vsel %vm1022_vm5, %v1701_v35, %v1019_v58  ;;  %v1031_v2 = vmul.f32 %v1707_v62, %v924_v40  ;;  %v927_v7 = vpop.xlane.xlu1 %926  ;;  %vm1036_vm7 = vweird.f32 %v1707_v62 }
 0x216   : > { %v2250_v9 = vpop.eup %1708  ;;  %v1028_v42 = vsel %vm1025_vm6, %v1027_v3, %v1023_v0  ;;  %1712 = vrcp.f32 %v927_v7  ;;  %v889_v19 = vmul.f32 1.442695, %v840_v4  ;;  %vm1037_vm9 = vmor %vm1035_vm8, %vm1036_vm7  ;;  %v1056_v10 = vand.u32 2147483648, %v927_v7 }
 0x217   : > { %v1029_v8 = vmul.f32 %v2096_v6, %v1028_v42  ;;  %v1032_v11 = vsub.f32 1.0, %v1031_v2  ;;  %v967_v18 = vsel %vm726_vm2, %v2250_v9, 0.0  ;;  %v2266_v20 = vpop.eup %1710  ;;  %v1054_v52 = vand.u32 2147483647, %v927_v7 }
 0x218   : > { %953 = vadd.xlane.f32.xlu1 %v952_v38  ;;  %968 = vadd.xlane.f32.xlu0 %v967_v18  ;;  %1714 = vpow2.f32 %v889_v19  ;;  %v961_v40 = vsel %vm726_vm2, %v2266_v20, 0.0  ;;  %vm1050_vm12 = vweird.f32 %v927_v7 }
 0x219   : > { %1495 = vst.msk [vmem:[%s2257_s19] sm:$0xff] %vm726_vm2, %v1029_v8  ;;  %v1033_v15 = vmul.f32 %v1707_v62, %v1032_v11  ;;  %vm1055_vm14 = vcmp.eq.f32.partialorder %v1054_v52, 8.507059e+37 }
 0x21b   : > { %v1034_v24 = vadd.f32 %v1707_v62, %v1033_v15  ;;  %v783_v6 = vpop.xlane.xlu0 %782 }
 0x21c   : > { %v1713_v35 = vpop.eup %1712  ;;  %v841_v21 = vsub.f32 %v2121_v29, %v783_v6 }
 0x21d   : > { %v1038_v31 = vsel %vm1037_vm9, %v1707_v62, %v1034_v24  ;;  %v1046_v34 = vmul.f32 %v1713_v35, %v927_v7  ;;  %v930_v41 = vpop.xlane.xlu2 %929  ;;  %vm1051_vm11 = vweird.f32 %v1713_v35 }
 0x21e   : > { %v1043_v45 = vsel %vm1040_vm10, %v1042_v25, %v1038_v31  ;;  %v891_v46 = vmul.f32 1.442695, %v841_v21  ;;  %1716 = vrcp.f32 %v930_v41  ;;  %v2274_v27 = vpop.eup %1714  ;;  %vm1052_vm13 = vmor %vm1050_vm12, %vm1051_vm11  ;;  %v1071_v16 = vand.u32 2147483648, %v930_v41 }
 0x21f   : > { %v1044_v57 = vmul.f32 %v2106_v14, %v1043_v45  ;;  %v1047_v51 = vsub.f32 1.0, %v1046_v34  ;;  %v1057_v14 = vor.u32 1.1754944e-38, %v1056_v10  ;;  %v970_v7 = vsel %vm726_vm2, %v2274_v27, 0.0 }
 0x220   : > { %1718 = vpow2.f32 %v891_v46  ;;  %962 = vadd.xlane.f32.xlu1 %v961_v40  ;;  %v1069_v15 = vand.u32 2147483647, %v930_v41  ;;  %vm1065_vm0 = vweird.f32 %v930_v41  ;;  %v1072_v24 = vor.u32 1.1754944e-38, %v1071_v16 }
 0x221   : > { %1496 = vst.msk [vmem:[%s2257_s19 + $0x8] sm:$0xff] %vm726_vm2, %v1044_v57  ;;  %v1048_v29 = vmul.f32 %v1713_v35, %v1047_v51 }
 0x222   : > { %vm1070_vm3 = vcmp.eq.f32.partialorder %v1069_v15, 8.507059e+37 }
 0x223   : > { %v1049_v61 = vadd.f32 %v1713_v35, %v1048_v29  ;;  %v786_v58 = vpop.xlane.xlu1 %785 }
 0x224   : > { %v1717_v60 = vpop.eup %1716  ;;  %v842_v62 = vsub.f32 %v2131_v39, %v786_v58 }
 0x225   : > { %v1053_v3 = vsel %vm1052_vm13, %v1713_v35, %v1049_v61  ;;  %v1061_v0 = vmul.f32 %v1717_v60, %v930_v41  ;;  %v933_v2 = vpop.xlane.xlu0 %932  ;;  %vm1066_vm15 = vweird.f32 %v1717_v60 }
 0x226   : > { %v2277_v4 = vpop.eup %1718  ;;  %v1058_v42 = vsel %vm1055_vm14, %v1057_v14, %v1053_v3  ;;  %v893_v8 = vmul.f32 1.442695, %v842_v62  ;;  %1720 = vrcp.f32 %v933_v2  ;;  %vm1067_vm1 = vmor %vm1065_vm0, %vm1066_vm15  ;;  %v1086_v41 = vand.u32 2147483648, %v933_v2 }
 0x227   : > { %v1059_v11 = vmul.f32 %v2116_v22, %v1058_v42  ;;  %v1062_v38 = vsub.f32 1.0, %v1061_v0  ;;  %v973_v39 = vsel %vm726_vm2, %v2277_v4, 0.0  ;;  %v1084_v40 = vand.u32 2147483647, %v933_v2 }
 0x228   : > { %1722 = vpow2.f32 %v893_v8  ;;  %971 = vadd.xlane.f32.xlu1 %v970_v7  ;;  %974 = vadd.xlane.f32.xlu2 %v973_v39  ;;  %vm1080_vm5 = vweird.f32 %v933_v2  ;;  %v1087_v61 = vor.u32 1.1754944e-38, %v1086_v41 }
 0x229   : > { %1497 = vst.msk [vmem:[%s2257_s19 + $0x10] sm:$0xff] %vm726_vm2, %v1059_v11  ;;  %v1063_v18 = vmul.f32 %v1717_v60, %v1062_v38  ;;  %vm1085_vm7 = vcmp.eq.f32.partialorder %v1084_v40, 8.507059e+37 }
 0x22b   : > { %v1064_v1 = vadd.f32 %v1717_v60, %v1063_v18  ;;  %v789_v19 = vpop.xlane.xlu2 %788 }
 0x22c   : > { %v1721_v22 = vpop.eup %1720  ;;  %v843_v6 = vsub.f32 %v2141_v48, %v789_v19 }
 0x22d   : > { %v1068_v35 = vsel %vm1067_vm1, %v1717_v60, %v1064_v1  ;;  %v1076_v25 = vmul.f32 %v1721_v22, %v933_v2  ;;  %v936_v21 = vpop.xlane.xlu1 %935  ;;  %vm1081_vm4 = vweird.f32 %v1721_v22 }
 0x22e   : > { %v2287_v31 = vpop.eup %1722  ;;  %v1073_v34 = vsel %vm1070_vm3, %v1072_v24, %v1068_v35  ;;  %v895_v45 = vmul.f32 1.442695, %v843_v6  ;;  %1724 = vrcp.f32 %v936_v21  ;;  %vm1082_vm6 = vmor %vm1080_vm5, %vm1081_vm4  ;;  %v1101_v2 = vand.u32 2147483648, %v936_v21 }
 0x22f   : > { %v1074_v46 = vmul.f32 %v2126_v33, %v1073_v34  ;;  %v1077_v57 = vsub.f32 1.0, %v1076_v25  ;;  %v976_v51 = vsel %vm726_vm2, %v2287_v31, 0.0  ;;  %v1099_v38 = vand.u32 2147483647, %v936_v21 }
 0x230   : > { %1726 = vpow2.f32 %v895_v45  ;;  %977 = vadd.xlane.f32.xlu0 %v976_v51  ;;  %vm1095_vm9 = vweird.f32 %v936_v21  ;;  %v1102_v18 = vor.u32 1.1754944e-38, %v1101_v2 }
 0x231   : > { %1498 = vst.msk [vmem:[%s2257_s19 + $0x18] sm:$0xff] %vm726_vm2, %v1074_v46  ;;  %v1078_v48 = vmul.f32 %v1721_v22, %v1077_v57  ;;  %vm1100_vm11 = vcmp.eq.f32.partialorder %v1099_v38, 8.507059e+37 }
 0x233   : > { %v1079_v10 = vadd.f32 %v1721_v22, %v1078_v48  ;;  %v792_v29 = vpop.xlane.xlu0 %791 }
 0x234   : > { %v1725_v52 = vpop.eup %1724  ;;  %v844_v33 = vsub.f32 %v2151_v59, %v792_v29 }
 0x235   : > { %v1083_v58 = vsel %vm1082_vm6, %v1721_v22, %v1079_v10  ;;  %v1091_v60 = vmul.f32 %v1725_v52, %v936_v21  ;;  %v939_v14 = vpop.xlane.xlu2 %938  ;;  %vm1096_vm8 = vweird.f32 %v1725_v52 }
 0x236   : > { %v2295_v62 = vpop.eup %1726  ;;  %v1088_v3 = vsel %vm1085_vm7, %v1087_v61, %v1083_v58  ;;  %v897_v0 = vmul.f32 1.442695, %v844_v33  ;;  %1728 = vrcp.f32 %v939_v14  ;;  %vm1097_vm10 = vmor %vm1095_vm9, %vm1096_vm8  ;;  %v1116_v21 = vand.u32 2147483648, %v939_v14 }
 0x237   : > { %v1089_v42 = vmul.f32 %v2136_v43, %v1088_v3  ;;  %v1092_v8 = vsub.f32 1.0, %v1091_v60  ;;  %v979_v11 = vsel %vm726_vm2, %v2295_v62, 0.0  ;;  %v1114_v45 = vand.u32 2147483647, %v939_v14 }
 0x238   : > { %1730 = vpow2.f32 %v897_v0  ;;  %980 = vadd.xlane.f32.xlu1 %v979_v11  ;;  %vm1110_vm13 = vweird.f32 %v939_v14  ;;  %v1117_v51 = vor.u32 1.1754944e-38, %v1116_v21 }
 0x239   : > { %1499 = vst.msk [vmem:[%s2257_s19 + $0x20] sm:$0xff] %vm726_vm2, %v1089_v42  ;;  %v1093_v59 = vmul.f32 %v1725_v52, %v1092_v8  ;;  %vm1115_vm15 = vcmp.eq.f32.partialorder %v1114_v45, 8.507059e+37 }
 0x23b   : > { %v1094_v7 = vadd.f32 %v1725_v52, %v1093_v59  ;;  %v795_v16 = vpop.xlane.xlu1 %794 }
 0x23c   : > { %v1729_v39 = vpop.eup %1728  ;;  %v845_v43 = vsub.f32 %v2161_v5, %v795_v16 }
 0x23d   : > { %v1098_v15 = vsel %vm1097_vm10, %v1725_v52, %v1094_v7  ;;  %v1106_v1 = vmul.f32 %v1729_v39, %v939_v14  ;;  %v942_v19 = vpop.xlane.xlu0 %941  ;;  %vm1111_vm12 = vweird.f32 %v1729_v39 }
 0x23e   : > { %v2303_v22 = vpop.eup %1730  ;;  %v1103_v24 = vsel %vm1100_vm11, %v1102_v18, %v1098_v15  ;;  %v899_v6 = vmul.f32 1.442695, %v845_v43  ;;  %1732 = vrcp.f32 %v942_v19  ;;  %vm1112_vm14 = vmor %vm1110_vm13, %vm1111_vm12  ;;  %v1131_v60 = vand.u32 2147483648, %v942_v19 }
 0x23f   : > { %v1104_v35 = vmul.f32 %v2146_v53, %v1103_v24  ;;  %v1107_v25 = vsub.f32 1.0, %v1106_v1  ;;  %v982_v34 = vsel %vm726_vm2, %v2303_v22, 0.0  ;;  %v1129_v3 = vand.u32 2147483647, %v942_v19 }
 0x240   : > { %1734 = vpow2.f32 %v899_v6  ;;  %983 = vadd.xlane.f32.xlu2 %v982_v34  ;;  %vm1125_vm1 = vweird.f32 %v942_v19  ;;  %v1132_v2 = vor.u32 1.1754944e-38, %v1131_v60 }
 0x241   : > { %1500 = vst.msk [vmem:[%s2257_s19 + $0x28] sm:$0xff] %vm726_vm2, %v1104_v35  ;;  %v1108_v5 = vmul.f32 %v1729_v39, %v1107_v25  ;;  %vm1130_vm4 = vcmp.eq.f32.partialorder %v1129_v3, 8.507059e+37 }
 0x243   : > { %v1109_v46 = vadd.f32 %v1729_v39, %v1108_v5  ;;  %v798_v57 = vpop.xlane.xlu2 %797 }
 0x244   : > { %v1733_v41 = vpop.eup %1732  ;;  %v846_v53 = vsub.f32 %v2171_v13, %v798_v57 }
 0x245   : > { %v1113_v48 = vsel %vm1112_vm14, %v1729_v39, %v1109_v46  ;;  %v1121_v40 = vmul.f32 %v1733_v41, %v942_v19  ;;  %v945_v10 = vpop.xlane.xlu1 %944  ;;  %vm1126_vm0 = vweird.f32 %v1733_v41 }
 0x246   : > { %v2311_v29 = vpop.eup %1734  ;;  %v1118_v52 = vsel %vm1115_vm15, %v1117_v51, %v1113_v48  ;;  %v901_v61 = vmul.f32 1.442695, %v846_v53  ;;  %1736 = vrcp.f32 %v945_v10  ;;  %vm1127_vm3 = vmor %vm1125_vm1, %vm1126_vm0  ;;  %v1146_v15 = vand.u32 2147483648, %v945_v10 }
 0x247   : > { %v1119_v33 = vmul.f32 %v2156_v63, %v1118_v52  ;;  %v1122_v58 = vsub.f32 1.0, %v1121_v40  ;;  %v985_v14 = vsel %vm726_vm2, %v2311_v29, 0.0  ;;  %v1144_v19 = vand.u32 2147483647, %v945_v10 }
 0x248   : > { %1738 = vpow2.f32 %v901_v61  ;;  %986 = vadd.xlane.f32.xlu0 %v985_v14  ;;  %vm1140_vm6 = vweird.f32 %v945_v10  ;;  %v1147_v25 = vor.u32 1.1754944e-38, %v1146_v15 }
 0x249   : > { %1501 = vst.msk [vmem:[%s2257_s19 + $0x30] sm:$0xff] %vm726_vm2, %v1119_v33  ;;  %v1123_v13 = vmul.f32 %v1733_v41, %v1122_v58  ;;  %vm1145_vm8 = vcmp.eq.f32.partialorder %v1144_v19, 8.507059e+37 }
 0x24b   : > { %v1124_v0 = vadd.f32 %v1733_v41, %v1123_v13  ;;  %v801_v42 = vpop.xlane.xlu0 %800 }
 0x24c   : > { %v1737_v8 = vpop.eup %1736  ;;  %v847_v63 = vsub.f32 %v2181_v23, %v801_v42 }
 0x24d   : > { %v1128_v11 = vsel %vm1127_vm3, %v1733_v41, %v1124_v0  ;;  %v1136_v59 = vmul.f32 %v1737_v8, %v945_v10  ;;  %v948_v38 = vpop.xlane.xlu2 %947  ;;  %vm1141_vm5 = vweird.f32 %v1737_v8 }
 0x24e   : > { %v2319_v7 = vpop.eup %1738  ;;  %v1133_v16 = vsel %vm1130_vm4, %v1132_v2, %v1128_v11  ;;  %v903_v39 = vmul.f32 1.442695, %v847_v63  ;;  %1740 = vrcp.f32 %v948_v38  ;;  %vm1142_vm7 = vmor %vm1140_vm6, %vm1141_vm5  ;;  %v1161_v53 = vand.u32 2147483648, %v948_v38 }
 0x24f   : > { %v1134_v18 = vmul.f32 %v2166_v32, %v1133_v16  ;;  %v1137_v43 = vsub.f32 1.0, %v1136_v59  ;;  %v988_v1 = vsel %vm726_vm2, %v2319_v7, 0.0  ;;  %v1159_v40 = vand.u32 2147483647, %v948_v38 }
 0x250   : > { %1742 = vpow2.f32 %v903_v39  ;;  %989 = vadd.xlane.f32.xlu1 %v988_v1  ;;  %vm1155_vm10 = vweird.f32 %v948_v38  ;;  %v1162_v33 = vor.u32 1.1754944e-38, %v1161_v53 }
 0x251   : > { %1502 = vst.msk [vmem:[%s2257_s19 + $0x38] sm:$0xff] %vm726_vm2, %v1134_v18  ;;  %v1138_v23 = vmul.f32 %v1737_v8, %v1137_v43  ;;  %vm1160_vm12 = vcmp.eq.f32.partialorder %v1159_v40, 8.507059e+37 }
 0x253   : > { %v1139_v24 = vadd.f32 %v1737_v8, %v1138_v23  ;;  %v804_v6 = vpop.xlane.xlu1 %803 }
 0x254   : > { %v1741_v35 = vpop.eup %1740  ;;  %v848_v32 = vsub.f32 %v2191_v36, %v804_v6 }
 0x255   : > { %v1143_v21 = vsel %vm1142_vm7, %v1737_v8, %v1139_v24  ;;  %v1151_v34 = vmul.f32 %v1741_v35, %v948_v38  ;;  %v951_v5 = vpop.xlane.xlu0 %950  ;;  %vm1156_vm9 = vweird.f32 %v1741_v35 }
 0x256   : > { %v2327_v45 = vpop.eup %1742  ;;  %v1148_v46 = vsel %vm1145_vm8, %v1147_v25, %v1143_v21  ;;  %v905_v57 = vmul.f32 1.442695, %v848_v32  ;;  %1744 = vrcp.f32 %v951_v5  ;;  %vm1157_vm11 = vmor %vm1155_vm10, %vm1156_vm9  ;;  %v1176_v2 = vand.u32 2147483648, %v951_v5 }
 0x257   : > { %v1149_v41 = vmul.f32 %v2176_v17, %v1148_v46  ;;  %v1152_v51 = vsub.f32 1.0, %v1151_v34  ;;  %v991_v48 = vsel %vm726_vm2, %v2327_v45, 0.0  ;;  %vm1170_vm14 = vweird.f32 %v951_v5 }
 0x258   : > { %1746 = vpow2.f32 %v905_v57  ;;  %992 = vadd.xlane.f32.xlu2 %v991_v48  ;;  %v1177_v38 = vor.u32 1.1754944e-38, %v1176_v2 }
 0x259   : > { %1503 = vst.msk [vmem:[%s2257_s19 + $0x40] sm:$0xff] %vm726_vm2, %v1149_v41  ;;  %v1153_v36 = vmul.f32 %v1741_v35, %v1152_v51 }
 0x25b   : > { %v1154_v10 = vadd.f32 %v1741_v35, %v1153_v36  ;;  %v807_v52 = vpop.xlane.xlu2 %806 }
 0x25c   : > { %v1745_v61 = vpop.eup %1744  ;;  %v849_v17 = vsub.f32 %v2200_v56, %v807_v52  ;;  %v1174_v56 = vand.u32 2147483647, %v951_v5 }
 0x25d   : > { %v1158_v58 = vsel %vm1157_vm11, %v1741_v35, %v1154_v10  ;;  %v1166_v60 = vmul.f32 %v1745_v61, %v951_v5  ;;  %vm1171_vm13 = vweird.f32 %v1745_v61 }
 0x25e   : > { %v2335_v14 = vpop.eup %1746  ;;  %v1163_v13 = vsel %vm1160_vm12, %v1162_v33, %v1158_v58  ;;  %v907_v3 = vmul.f32 1.442695, %v849_v17  ;;  %vm1172_vm15 = vmor %vm1170_vm14, %vm1171_vm13  ;;  %vm1175_vm0 = vcmp.eq.f32.partialorder %v1174_v56, 8.507059e+37 }
 0x25f   : > { %v1164_v0 = vmul.f32 %v2186_v30, %v1163_v13  ;;  %v1167_v42 = vsub.f32 1.0, %v1166_v60  ;;  %v994_v8 = vsel %vm726_vm2, %v2335_v14, 0.0 }
 0x260   : > { %1748 = vpow2.f32 %v907_v3  ;;  %995 = vadd.xlane.f32.xlu0 %v994_v8 }
 0x261   : > { %1504 = vst.msk [vmem:[%s2257_s19 + $0x48] sm:$0xff] %vm726_vm2, %v1164_v0  ;;  %v1168_v63 = vmul.f32 %v1745_v61, %v1167_v42 }
 0x263   : > { %v1169_v11 = vadd.f32 %v1745_v61, %v1168_v63  ;;  %v810_v59 = vpop.xlane.xlu0 %809 }
 0x264   : > { %v850_v30 = vsub.f32 %v2205_v47, %v810_v59 }
 0x265   : > { %v1173_v16 = vsel %vm1172_vm15, %v1745_v61, %v1169_v11 }
 0x266   : > { %v2343_v39 = vpop.eup %1748  ;;  %v1178_v18 = vsel %vm1175_vm0, %v1177_v38, %v1173_v16  ;;  %v909_v43 = vmul.f32 1.442695, %v850_v30 }
 0x267   : > { %v1179_v15 = vmul.f32 %v2195_v28, %v1178_v18  ;;  %v997_v1 = vsel %vm726_vm2, %v2343_v39, 0.0 }
 0x268   : > { %1750 = vpow2.f32 %v909_v43  ;;  %998 = vadd.xlane.f32.xlu1 %v997_v1 }
 0x269   : > { %1505 = vst.msk [vmem:[%s2257_s19 + $0x50] sm:$0xff] %vm726_vm2, %v1179_v15 }
 0x26b   : > { %v813_v23 = vpop.xlane.xlu1 %812 }
 0x26c   : > { %v851_v19 = vsub.f32 %v2210_v55, %v813_v23 }
 0x26e   : > { %v2351_v24 = vpop.eup %1750  ;;  %v911_v47 = vmul.f32 1.442695, %v851_v19 }
 0x26f   : > { %v1000_v6 = vsel %vm726_vm2, %v2351_v24, 0.0 }
 0x270   : > { %1752 = vpow2.f32 %v911_v47  ;;  %1001 = vadd.xlane.f32.xlu2 %v1000_v6 }
 0x273   : > { %v816_v35 = vpop.xlane.xlu2 %815 }
 0x274   : > { %v852_v28 = vsub.f32 %v2217_v26, %v816_v35 }
 0x276   : > { %v2356_v25 = vpop.eup %1752  ;;  %v913_v32 = vmul.f32 1.442695, %v852_v28 }
 0x277   : > { %v1003_v21 = vsel %vm726_vm2, %v2356_v25, 0.0 }
 0x278   : > { %1754 = vpow2.f32 %v913_v32  ;;  %1004 = vadd.xlane.f32.xlu0 %v1003_v21 }
 0x27b   : > { %v957_v55 = vpop.xlane.xlu2 %956  ;;  %v819_v34 = vpop.xlane.xlu0 %818 }
 0x27c   : > { %1756 = vrcp.f32 %v957_v55  ;;  %v853_v5 = vsub.f32 %v2226_v49, %v819_v34  ;;  %v1206_v52 = vand.u32 2147483648, %v957_v55  ;;  %v1204_v17 = vand.u32 2147483647, %v957_v55 }
 0x27d   : > { %vm1200_vm3 = vweird.f32 %v957_v55 }
 0x27e   : > { %v2361_v46 = vpop.eup %1754  ;;  %v915_v57 = vmul.f32 1.442695, %v853_v5  ;;  %vm1205_vm5 = vcmp.eq.f32.partialorder %v1204_v17, 8.507059e+37 }
 0x27f   : > { %v1006_v41 = vsel %vm726_vm2, %v2361_v46, 0.0 }
 0x280   : > { %1007 = vadd.xlane.f32.xlu1 %v1006_v41  ;;  %1758 = vpow2.f32 %v915_v57 }
 0x282   : > { %v1757_v26 = vpop.eup %1756 }
 0x283   : > { %v1196_v51 = vmul.f32 %v1757_v26, %v957_v55  ;;  %v822_v53 = vpop.xlane.xlu1 %821  ;;  %v960_v48 = vpop.xlane.xlu0 %959  ;;  %vm1201_vm1 = vweird.f32 %v1757_v26 }
 0x284   : > { %v854_v36 = vsub.f32 %v2239_v37, %v822_v53  ;;  %v966_v40 = vpop.xlane.xlu2 %965  ;;  %1760 = vrcp.f32 %v960_v48  ;;  %vm1202_vm4 = vmor %vm1200_vm3, %vm1201_vm1  ;;  %v1207_v37 = vor.u32 1.1754944e-38, %v1206_v52  ;;  %v1221_v16 = vand.u32 2147483648, %v960_v48 }
 0x285   : > { %v1197_v10 = vsub.f32 1.0, %v1196_v51  ;;  %1762 = vrcp.f32 %v966_v40  ;;  %v1251_v18 = vand.u32 2147483648, %v966_v40  ;;  %v1219_v15 = vand.u32 2147483647, %v960_v48 }
 0x286   : > { %v917_v49 = vmul.f32 1.442695, %v854_v36  ;;  %v2366_v61 = vpop.eup %1758  ;;  %v1249_v23 = vand.u32 2147483647, %v966_v40  ;;  %vm1215_vm8 = vweird.f32 %v960_v48  ;;  %vm1245_vm9 = vweird.f32 %v966_v40 }
 0x287   : > { %v1198_v33 = vmul.f32 %v1757_v26, %v1197_v10  ;;  %v1009_v58 = vsel %vm726_vm2, %v2366_v61, 0.0  ;;  %v1222_v35 = vor.u32 1.1754944e-38, %v1221_v16  ;;  %v1252_v28 = vor.u32 1.1754944e-38, %v1251_v18 }
 0x288   : > { %1764 = vpow2.f32 %v917_v49  ;;  %1010 = vadd.xlane.f32.xlu2 %v1009_v58  ;;  %vm1220_vm12 = vcmp.eq.f32.partialorder %v1219_v15, 8.507059e+37  ;;  %vm1250_vm13 = vcmp.eq.f32.partialorder %v1249_v23, 8.507059e+37 }
 0x289   : > { %v1199_v60 = vadd.f32 %v1757_v26, %v1198_v33 }
 0x28a   : > { %v1761_v13 = vpop.eup %1760 }
 0x28b   : > { %v1763_v3 = vpop.eup %1762  ;;  %v1203_v0 = vsel %vm1202_vm4, %v1757_v26, %v1199_v60  ;;  %v1211_v42 = vmul.f32 %v1761_v13, %v960_v48  ;;  %v2370_v8 = vpop.xlane.xlu1 %953  ;;  %vm1216_vm6 = vweird.f32 %v1761_v13 }
 0x28c   : > { %v1208_v2 = vsel %vm1205_vm5, %v1207_v37, %v1203_v0  ;;  %v1241_v63 = vmul.f32 %v1763_v3, %v966_v40  ;;  %1766 = vrcp.f32 %v2370_v8  ;;  %v2373_v56 = vpop.xlane.xlu0 %968  ;;  %vm1246_vm7 = vweird.f32 %v1763_v3  ;;  %vm1217_vm10 = vmor %vm1215_vm8, %vm1216_vm6 }
 0x28d   : > { %v1209_v11 = vmul.f32 %v2222_v12, %v1208_v2  ;;  %v1212_v59 = vsub.f32 1.0, %v1211_v42  ;;  %1768 = vrcp.f32 %v2373_v56  ;;  %vm1247_vm11 = vmor %vm1245_vm9, %vm1246_vm7  ;;  %v1191_v36 = vand.u32 2147483648, %v2370_v8 }
 0x28e   : > { %v2376_v38 = vpop.eup %1764  ;;  %v1242_v30 = vsub.f32 1.0, %v1241_v63  ;;  %v1189_v10 = vand.u32 2147483647, %v2370_v8  ;;  %vm1185_vm15 = vweird.f32 %v2370_v8  ;;  %vm1260_vm3 = vweird.f32 %v2373_v56 }
 0x28f   : > { %1507 = vst.msk [vmem:[%s2257_s19 + $0x60] sm:$0xff] %vm726_vm2, %v1209_v11  ;;  %v1213_v43 = vmul.f32 %v1761_v13, %v1212_v59  ;;  %v1012_v19 = vsel %vm726_vm2, %v2376_v38, 0.0  ;;  %v1192_v58 = vor.u32 1.1754944e-38, %v1191_v36 }
 0x290   : > { %v1243_v1 = vmul.f32 %v1763_v3, %v1242_v30  ;;  %1013 = vadd.xlane.f32.xlu0 %v1012_v19  ;;  %vm1190_vm4 = vcmp.eq.f32.partialorder %v1189_v10, 8.507059e+37 }
 0x291   : > { %v1214_v12 = vadd.f32 %v1761_v13, %v1213_v43 }
 0x292   : > { %v1767_v47 = vpop.eup %1766  ;;  %v1244_v6 = vadd.f32 %v1763_v3, %v1243_v1 }
 0x293   : > { %v1218_v32 = vsel %vm1217_vm10, %v1761_v13, %v1214_v12  ;;  %v1181_v21 = vmul.f32 %v1767_v47, %v2370_v8  ;;  %v963_v55 = vpop.xlane.xlu1 %962  ;;  %v1769_v34 = vpop.eup %1768  ;;  %vm1186_vm14 = vweird.f32 %v1767_v47 }
 0x294   : > { %v1248_v5 = vsel %vm1247_vm11, %v1763_v3, %v1244_v6  ;;  %v1223_v57 = vsel %vm1220_vm12, %v1222_v35, %v1218_v32  ;;  %1770 = vrcp.f32 %v963_v55  ;;  %v1256_v53 = vmul.f32 %v1769_v34, %v2373_v56  ;;  %vm1187_vm1 = vmor %vm1185_vm15, %vm1186_vm14 }
 0x295   : > { %v1253_v41 = vsel %vm1250_vm13, %v1252_v28, %v1248_v5  ;;  %v1224_v26 = vmul.f32 %v2232_v44, %v1223_v57  ;;  %v1182_v51 = vsub.f32 1.0, %v1181_v21  ;;  %v1266_v44 = vand.u32 2147483648, %v2373_v56 }
 0x296   : > { %v1254_v48 = vmul.f32 %v2236_v50, %v1253_v41  ;;  %v1257_v52 = vsub.f32 1.0, %v1256_v53  ;;  %vm1261_vm0 = vweird.f32 %v1769_v34  ;;  %v1264_v50 = vand.u32 2147483647, %v2373_v56 }
 0x297   : > { %1508 = vst.msk [vmem:[%s2257_s19 + $0x68] sm:$0xff] %vm726_vm2, %v1224_v26  ;;  %v1183_v40 = vmul.f32 %v1767_v47, %v1182_v51  ;;  %vm1262_vm5 = vmor %vm1260_vm3, %vm1261_vm0  ;;  %v1267_v42 = vor.u32 1.1754944e-38, %v1266_v44  ;;  %v1236_v30 = vand.u32 2147483648, %v963_v55  ;;  %v1234_v18 = vand.u32 2147483647, %v963_v55 }
 0x298   : > { %1510 = vst.msk [vmem:[%s2257_s19 + $0x78] sm:$0xff] %vm726_vm2, %v1254_v48  ;;  %v1258_v33 = vmul.f32 %v1769_v34, %v1257_v52  ;;  %vm1265_vm6 = vcmp.eq.f32.partialorder %v1264_v50, 8.507059e+37  ;;  %vm1230_vm8 = vweird.f32 %v963_v55 }
 0x299   : > { %v1184_v49 = vadd.f32 %v1767_v47, %v1183_v40  ;;  %vm1235_vm10 = vcmp.eq.f32.partialorder %v1234_v18, 8.507059e+37 }
 0x29a   : > { %v1771_v17 = vpop.eup %1770  ;;  %v1259_v13 = vadd.f32 %v1769_v34, %v1258_v33 }
 0x29b   : > { %v1188_v60 = vsel %vm1187_vm1, %v1767_v47, %v1184_v49  ;;  %v1226_v37 = vmul.f32 %v1771_v17, %v963_v55  ;;  %v972_v3 = vpop.xlane.xlu1 %971  ;;  %v975_v8 = vpop.xlane.xlu2 %974  ;;  %vm1231_vm7 = vweird.f32 %v1771_v17 }
 0x29c   : > { %v1193_v0 = vsel %vm1190_vm4, %v1192_v58, %v1188_v60  ;;  %1772 = vrcp.f32 %v972_v3  ;;  %v1263_v63 = vsel %vm1262_vm5, %v1769_v34, %v1259_v13  ;;  %vm1232_vm9 = vmor %vm1230_vm8, %vm1231_vm7  ;;  %v1281_v28 = vand.u32 2147483648, %v972_v3 }
 0x29d   : > { %v1194_v2 = vmul.f32 %v2247_v54, %v1193_v0  ;;  %v1227_v11 = vsub.f32 1.0, %v1226_v37  ;;  %v1268_v59 = vsel %vm1265_vm6, %v1267_v42, %v1263_v63  ;;  %1774 = vrcp.f32 %v975_v8 }
 0x29e   : > { %v1269_v56 = vmul.f32 %v2250_v9, %v1268_v59  ;;  %v1237_v54 = vor.u32 1.1754944e-38, %v1236_v30  ;;  %v1279_v21 = vand.u32 2147483647, %v972_v3  ;;  %vm1275_vm12 = vweird.f32 %v972_v3 }
 0x29f   : > { %1506 = vst.msk [vmem:[%s2257_s19 + $0x58] sm:$0xff] %vm726_vm2, %v1194_v2  ;;  %v1228_v16 = vmul.f32 %v1771_v17, %v1227_v11  ;;  %v1296_v34 = vand.u32 2147483648, %v975_v8  ;;  %v1294_v41 = vand.u32 2147483647, %v975_v8  ;;  %v1282_v26 = vor.u32 1.1754944e-38, %v1281_v28 }
 0x2a0   : > { %1511 = vst.msk [vmem:[%s2257_s19 + $0x80] sm:$0xff] %vm726_vm2, %v1269_v56  ;;  %vm1280_vm15 = vcmp.eq.f32.partialorder %v1279_v21, 8.507059e+37  ;;  %vm1290_vm0 = vweird.f32 %v975_v8 }
 0x2a1   : > { %v1229_v43 = vadd.f32 %v1771_v17, %v1228_v16  ;;  %v1297_v36 = vor.u32 1.1754944e-38, %v1296_v34  ;;  %vm1295_vm3 = vcmp.eq.f32.partialorder %v1294_v41, 8.507059e+37 }
 0x2a2   : > { %v1773_v15 = vpop.eup %1772 }
 0x2a3   : > { %v1233_v1 = vsel %vm1232_vm9, %v1771_v17, %v1229_v43  ;;  %v1271_v23 = vmul.f32 %v1773_v15, %v972_v3  ;;  %v1775_v19 = vpop.eup %1774  ;;  %v978_v47 = vpop.xlane.xlu0 %977  ;;  %vm1276_vm11 = vweird.f32 %v1773_v15 }
 0x2a4   : > { %v1238_v12 = vsel %vm1235_vm10, %v1237_v54, %v1233_v1  ;;  %v1286_v35 = vmul.f32 %v1775_v19, %v975_v8  ;;  %1776 = vrcp.f32 %v978_v47  ;;  %vm1291_vm13 = vweird.f32 %v1775_v19  ;;  %vm1277_vm14 = vmor %vm1275_vm12, %vm1276_vm11 }
 0x2a5   : > { %v1239_v6 = vmul.f32 %v2266_v20, %v1238_v12  ;;  %v1272_v9 = vsub.f32 1.0, %v1271_v23  ;;  %vm1292_vm1 = vmor %vm1290_vm0, %vm1291_vm13  ;;  %v1311_v17 = vand.u32 2147483648, %v978_v47  ;;  %v1309_v60 = vand.u32 2147483647, %v978_v47 }
 0x2a6   : > { %v1287_v55 = vsub.f32 1.0, %v1286_v35  ;;  %vm1305_vm5 = vweird.f32 %v978_v47 }
 0x2a7   : > { %1509 = vst.msk [vmem:[%s2257_s19 + $0x70] sm:$0xff] %vm726_vm2, %v1239_v6  ;;  %v1273_v32 = vmul.f32 %v1773_v15, %v1272_v9  ;;  %v1312_v37 = vor.u32 1.1754944e-38, %v1311_v17  ;;  %vm1310_vm7 = vcmp.eq.f32.partialorder %v1309_v60, 8.507059e+37 }
 0x2a8   : > { %v1288_v57 = vmul.f32 %v1775_v19, %v1287_v55 }
 0x2a9   : > { %v1274_v5 = vadd.f32 %v1773_v15, %v1273_v32 }
 0x2aa   : > { %v1289_v51 = vadd.f32 %v1775_v19, %v1288_v57  ;;  %v1777_v53 = vpop.eup %1776 }
 0x2ab   : > { %v1278_v20 = vsel %vm1277_vm14, %v1773_v15, %v1274_v5  ;;  %v981_v40 = vpop.xlane.xlu1 %980  ;;  %v1301_v44 = vmul.f32 %v1777_v53, %v978_v47  ;;  %vm1306_vm4 = vweird.f32 %v1777_v53 }
 0x2ac   : > { %v1283_v48 = vsel %vm1280_vm15, %v1282_v26, %v1278_v20  ;;  %v1293_v52 = vsel %vm1292_vm1, %v1775_v19, %v1289_v51  ;;  %1778 = vrcp.f32 %v981_v40  ;;  %vm1307_vm6 = vmor %vm1305_vm5, %vm1306_vm4  ;;  %v1326_v63 = vand.u32 2147483648, %v981_v40 }
 0x2ad   : > { %v1284_v10 = vmul.f32 %v2274_v27, %v1283_v48  ;;  %v1298_v49 = vsel %vm1295_vm3, %v1297_v36, %v1293_v52  ;;  %v1302_v50 = vsub.f32 1.0, %v1301_v44  ;;  %v1324_v59 = vand.u32 2147483647, %v981_v40 }
 0x2ae   : > { %v1299_v33 = vmul.f32 %v2277_v4, %v1298_v49  ;;  %vm1320_vm9 = vweird.f32 %v981_v40  ;;  %v1327_v16 = vor.u32 1.1754944e-38, %v1326_v63 }
 0x2af   : > { %1512 = vst.msk [vmem:[%s2257_s19 + $0x88] sm:$0xff] %vm726_vm2, %v1284_v10  ;;  %v1303_v58 = vmul.f32 %v1777_v53, %v1302_v50  ;;  %vm1325_vm11 = vcmp.eq.f32.partialorder %v1324_v59, 8.507059e+37 }
 0x2b0   : > { %1513 = vst.msk [vmem:[%s2257_s19 + $0x90] sm:$0xff] %vm726_vm2, %v1299_v33 }
 0x2b1   : > { %v1304_v13 = vadd.f32 %v1777_v53, %v1303_v58 }
 0x2b2   : > { %v1779_v27 = vpop.eup %1778 }
 0x2b3   : > { %v984_v3 = vpop.xlane.xlu2 %983  ;;  %v1308_v0 = vsel %vm1307_vm6, %v1777_v53, %v1304_v13  ;;  %v1316_v42 = vmul.f32 %v1779_v27, %v981_v40  ;;  %vm1321_vm8 = vweird.f32 %v1779_v27 }
 0x2b4   : > { %1780 = vrcp.f32 %v984_v3  ;;  %v1313_v8 = vsel %vm1310_vm7, %v1312_v37, %v1308_v0  ;;  %vm1322_vm10 = vmor %vm1320_vm9, %vm1321_vm8  ;;  %v1341_v23 = vand.u32 2147483648, %v984_v3  ;;  %v1339_v12 = vand.u32 2147483647, %v984_v3 }
 0x2b5   : > { %v1314_v4 = vmul.f32 %v2287_v31, %v1313_v8  ;;  %v1317_v2 = vsub.f32 1.0, %v1316_v42  ;;  %vm1335_vm13 = vweird.f32 %v984_v3 }
 0x2b6   : > { %v1342_v9 = vor.u32 1.1754944e-38, %v1341_v23  ;;  %vm1340_vm15 = vcmp.eq.f32.partialorder %v1339_v12, 8.507059e+37 }
 0x2b7   : > { %1514 = vst.msk [vmem:[%s2257_s19 + $0x98] sm:$0xff] %vm726_vm2, %v1314_v4  ;;  %v1318_v11 = vmul.f32 %v1779_v27, %v1317_v2 }
 0x2b9   : > { %v1319_v56 = vadd.f32 %v1779_v27, %v1318_v11 }
 0x2ba   : > { %v1781_v30 = vpop.eup %1780 }
 0x2bb   : > { %v1331_v18 = vmul.f32 %v1781_v30, %v984_v3  ;;  %v987_v43 = vpop.xlane.xlu0 %986  ;;  %v1323_v15 = vsel %vm1322_vm10, %v1779_v27, %v1319_v56  ;;  %vm1336_vm12 = vweird.f32 %v1781_v30 }
 0x2bc   : > { %1782 = vrcp.f32 %v987_v43  ;;  %v1328_v54 = vsel %vm1325_vm11, %v1327_v16, %v1323_v15  ;;  %vm1337_vm14 = vmor %vm1335_vm13, %vm1336_vm12  ;;  %v1356_v34 = vand.u32 2147483648, %v987_v43  ;;  %v1354_v57 = vand.u32 2147483647, %v987_v43 }
 0x2bd   : > { %v1332_v31 = vsub.f32 1.0, %v1331_v18  ;;  %v1329_v1 = vmul.f32 %v2295_v62, %v1328_v54  ;;  %vm1350_vm1 = vweird.f32 %v987_v43 }
 0x2be   : > { %v1357_v20 = vor.u32 1.1754944e-38, %v1356_v34  ;;  %vm1355_vm4 = vcmp.eq.f32.partialorder %v1354_v57, 8.507059e+37 }
 0x2bf   : > { %v1333_v19 = vmul.f32 %v1781_v30, %v1332_v31  ;;  %1515 = vst.msk [vmem:[%s2257_s19 + $0xa0] sm:$0xff] %vm726_vm2, %v1329_v1 }
 0x2c1   : > { %v1334_v47 = vadd.f32 %v1781_v30, %v1333_v19 }
 0x2c2   : > { %v1783_v6 = vpop.eup %1782 }
 0x2c3   : > { %v1338_v35 = vsel %vm1337_vm14, %v1781_v30, %v1334_v47  ;;  %v1346_v28 = vmul.f32 %v1783_v6, %v987_v43  ;;  %v990_v32 = vpop.xlane.xlu1 %989  ;;  %vm1351_vm0 = vweird.f32 %v1783_v6 }
 0x2c4   : > { %v1343_v21 = vsel %vm1340_vm15, %v1342_v9, %v1338_v35  ;;  %1784 = vrcp.f32 %v990_v32  ;;  %vm1352_vm3 = vmor %vm1350_vm1, %vm1351_vm0  ;;  %v1371_v10 = vand.u32 2147483648, %v990_v32  ;;  %v1369_v44 = vand.u32 2147483647, %v990_v32 }
 0x2c5   : > { %v1344_v62 = vmul.f32 %v2303_v22, %v1343_v21  ;;  %v1347_v55 = vsub.f32 1.0, %v1346_v28  ;;  %vm1365_vm6 = vweird.f32 %v990_v32 }
 0x2c6   : > { %v1372_v50 = vor.u32 1.1754944e-38, %v1371_v10  ;;  %vm1370_vm8 = vcmp.eq.f32.partialorder %v1369_v44, 8.507059e+37 }
 0x2c7   : > { %1516 = vst.msk [vmem:[%s2257_s19 + $0xa8] sm:$0xff] %vm726_vm2, %v1344_v62  ;;  %v1348_v5 = vmul.f32 %v1783_v6, %v1347_v55 }
 0x2c9   : > { %v1349_v41 = vadd.f32 %v1783_v6, %v1348_v5 }
 0x2ca   : > { %v1785_v26 = vpop.eup %1784 }
 0x2cb   : > { %v1353_v51 = vsel %vm1352_vm3, %v1783_v6, %v1349_v41  ;;  %v1361_v53 = vmul.f32 %v1785_v26, %v990_v32  ;;  %v993_v48 = vpop.xlane.xlu2 %992  ;;  %vm1366_vm5 = vweird.f32 %v1785_v26 }
 0x2cc   : > { %v1358_v36 = vsel %vm1355_vm4, %v1357_v20, %v1353_v51  ;;  %1786 = vrcp.f32 %v993_v48  ;;  %vm1367_vm7 = vmor %vm1365_vm6, %vm1366_vm5  ;;  %v1386_v37 = vand.u32 2147483648, %v993_v48  ;;  %v1384_v0 = vand.u32 2147483647, %v993_v48 }
 0x2cd   : > { %v1359_v22 = vmul.f32 %v2311_v29, %v1358_v36  ;;  %v1362_v40 = vsub.f32 1.0, %v1361_v53  ;;  %vm1380_vm10 = vweird.f32 %v993_v48 }
 0x2ce   : > { %v1387_v4 = vor.u32 1.1754944e-38, %v1386_v37  ;;  %vm1385_vm12 = vcmp.eq.f32.partialorder %v1384_v0, 8.507059e+37 }
 0x2cf   : > { %1517 = vst.msk [vmem:[%s2257_s19 + $0xb0] sm:$0xff] %vm726_vm2, %v1359_v22  ;;  %v1363_v52 = vmul.f32 %v1785_v26, %v1362_v40 }
 0x2d1   : > { %v1364_v49 = vadd.f32 %v1785_v26, %v1363_v52 }
 0x2d2   : > { %v1787_v33 = vpop.eup %1786 }
 0x2d3   : > { %v996_v17 = vpop.xlane.xlu0 %995  ;;  %v1368_v58 = vsel %vm1367_vm7, %v1785_v26, %v1364_v49  ;;  %v1376_v60 = vmul.f32 %v1787_v33, %v993_v48  ;;  %vm1381_vm9 = vweird.f32 %v1787_v33 }
 0x2d4   : > { %1788 = vrcp.f32 %v996_v17  ;;  %v1373_v13 = vsel %vm1370_vm8, %v1372_v50, %v1368_v58  ;;  %vm1382_vm11 = vmor %vm1380_vm10, %vm1381_vm9  ;;  %v1401_v56 = vand.u32 2147483648, %v996_v17  ;;  %v1399_v18 = vand.u32 2147483647, %v996_v17 }
 0x2d5   : > { %v1374_v29 = vmul.f32 %v2319_v7, %v1373_v13  ;;  %v1377_v27 = vsub.f32 1.0, %v1376_v60  ;;  %vm1395_vm14 = vweird.f32 %v996_v17 }
 0x2d6   : > { %v1402_v54 = vor.u32 1.1754944e-38, %v1401_v56  ;;  %vm1400_vm0 = vcmp.eq.f32.partialorder %v1399_v18, 8.507059e+37 }
 0x2d7   : > { %1518 = vst.msk [vmem:[%s2257_s19 + $0xb8] sm:$0xff] %vm726_vm2, %v1374_v29  ;;  %v1378_v3 = vmul.f32 %v1787_v33, %v1377_v27 }
 0x2d9   : > { %v1379_v8 = vadd.f32 %v1787_v33, %v1378_v3 }
 0x2da   : > { %v1789_v42 = vpop.eup %1788 }
 0x2db   : > { %v1391_v2 = vmul.f32 %v1789_v42, %v996_v17  ;;  %v999_v63 = vpop.xlane.xlu1 %998  ;;  %v1383_v11 = vsel %vm1382_vm11, %v1787_v33, %v1379_v8  ;;  %vm1396_vm13 = vweird.f32 %v1789_v42 }
 0x2dc   : > { %1790 = vrcp.f32 %v999_v63  ;;  %v1388_v59 = vsel %vm1385_vm12, %v1387_v4, %v1383_v11  ;;  %vm1397_vm15 = vmor %vm1395_vm14, %vm1396_vm13  ;;  %v1416_v47 = vand.u32 2147483648, %v999_v63  ;;  %v1414_v9 = vand.u32 2147483647, %v999_v63 }
 0x2dd   : > { %v1392_v7 = vsub.f32 1.0, %v1391_v2  ;;  %v1389_v30 = vmul.f32 %v2327_v45, %v1388_v59  ;;  %vm1410_vm3 = vweird.f32 %v999_v63 }
 0x2de   : > { %v1417_v32 = vor.u32 1.1754944e-38, %v1416_v47  ;;  %vm1415_vm5 = vcmp.eq.f32.partialorder %v1414_v9, 8.507059e+37 }
 0x2df   : > { %v1393_v16 = vmul.f32 %v1789_v42, %v1392_v7  ;;  %1519 = vst.msk [vmem:[%s2257_s19 + $0xc0] sm:$0xff] %vm726_vm2, %v1389_v30 }
 0x2e1   : > { %v1394_v43 = vadd.f32 %v1789_v42, %v1393_v16 }
 0x2e2   : > { %v1791_v15 = vpop.eup %1790 }
 0x2e3   : > { %v1398_v31 = vsel %vm1397_vm15, %v1789_v42, %v1394_v43  ;;  %v1406_v1 = vmul.f32 %v1791_v15, %v999_v63  ;;  %v1002_v23 = vpop.xlane.xlu2 %1001  ;;  %vm1411_vm1 = vweird.f32 %v1791_v15 }
 0x2e4   : > { %v1403_v19 = vsel %vm1400_vm0, %v1402_v54, %v1398_v31  ;;  %1792 = vrcp.f32 %v1002_v23  ;;  %vm1412_vm4 = vmor %vm1410_vm3, %vm1411_vm1  ;;  %v1431_v57 = vand.u32 2147483648, %v1002_v23  ;;  %v1429_v26 = vand.u32 2147483647, %v1002_v23 }
 0x2e5   : > { %v1404_v45 = vmul.f32 %v2335_v14, %v1403_v19  ;;  %v1407_v12 = vsub.f32 1.0, %v1406_v1  ;;  %vm1425_vm7 = vweird.f32 %v1002_v23 }
 0x2e6   : > { %v1432_v53 = vor.u32 1.1754944e-38, %v1431_v57  ;;  %vm1430_vm9 = vcmp.eq.f32.partialorder %v1429_v26, 8.507059e+37 }
 0x2e7   : > { %1520 = vst.msk [vmem:[%s2257_s19 + $0xc8] sm:$0xff] %vm726_vm2, %v1404_v45  ;;  %v1408_v6 = vmul.f32 %v1791_v15, %v1407_v12 }
 0x2e9   : > { %v1409_v35 = vadd.f32 %v1791_v15, %v1408_v6 }
 0x2ea   : > { %v1793_v28 = vpop.eup %1792 }
 0x2eb   : > { %v1413_v21 = vsel %vm1412_vm4, %v1791_v15, %v1409_v35  ;;  %v1421_v62 = vmul.f32 %v1793_v28, %v1002_v23  ;;  %v1005_v55 = vpop.xlane.xlu0 %1004  ;;  %vm1426_vm6 = vweird.f32 %v1793_v28 }
 0x2ec   : > { %v1418_v34 = vsel %vm1415_vm5, %v1417_v32, %v1413_v21  ;;  %1794 = vrcp.f32 %v1005_v55  ;;  %vm1427_vm8 = vmor %vm1425_vm7, %vm1426_vm6  ;;  %v1446_v52 = vand.u32 2147483648, %v1005_v55  ;;  %v1444_v49 = vand.u32 2147483647, %v1005_v55 }
 0x2ed   : > { %v1419_v14 = vmul.f32 %v2343_v39, %v1418_v34  ;;  %v1422_v5 = vsub.f32 1.0, %v1421_v62  ;;  %vm1440_vm11 = vweird.f32 %v1005_v55 }
 0x2ee   : > { %v1447_v17 = vor.u32 1.1754944e-38, %v1446_v52  ;;  %vm1445_vm13 = vcmp.eq.f32.partialorder %v1444_v49, 8.507059e+37 }
 0x2ef   : > { %1521 = vst.msk [vmem:[%s2257_s19 + $0xd0] sm:$0xff] %vm726_vm2, %v1419_v14  ;;  %v1423_v41 = vmul.f32 %v1793_v28, %v1422_v5 }
 0x2f1   : > { %v1424_v20 = vadd.f32 %v1793_v28, %v1423_v41 }
 0x2f2   : > { %v1795_v51 = vpop.eup %1794 }
 0x2f3   : > { %v1428_v48 = vsel %vm1427_vm8, %v1793_v28, %v1424_v20  ;;  %v1436_v36 = vmul.f32 %v1795_v51, %v1005_v55  ;;  %v1008_v22 = vpop.xlane.xlu1 %1007  ;;  %vm1441_vm10 = vweird.f32 %v1795_v51 }
 0x2f4   : > { %v1433_v40 = vsel %vm1430_vm9, %v1432_v53, %v1428_v48  ;;  %1796 = vrcp.f32 %v1008_v22  ;;  %vm1442_vm12 = vmor %vm1440_vm11, %vm1441_vm10  ;;  %v1461_v37 = vand.u32 2147483648, %v1008_v22  ;;  %v1459_v0 = vand.u32 2147483647, %v1008_v22 }
 0x2f5   : > { %v1434_v39 = vmul.f32 %v2351_v24, %v1433_v40  ;;  %v1437_v10 = vsub.f32 1.0, %v1436_v36  ;;  %vm1455_vm15 = vweird.f32 %v1008_v22 }
 0x2f6   : > { %v1462_v8 = vor.u32 1.1754944e-38, %v1461_v37  ;;  %vm1460_vm1 = vcmp.eq.f32.partialorder %v1459_v0, 8.507059e+37 }
 0x2f7   : > { %1522 = vst.msk [vmem:[%s2257_s19 + $0xd8] sm:$0xff] %vm726_vm2, %v1434_v39  ;;  %v1438_v44 = vmul.f32 %v1795_v51, %v1437_v10 }
 0x2f9   : > { %v1439_v33 = vadd.f32 %v1795_v51, %v1438_v44 }
 0x2fa   : > { %v1797_v50 = vpop.eup %1796 }
 0x2fb   : > { %v1443_v58 = vsel %vm1442_vm12, %v1795_v51, %v1439_v33  ;;  %v1451_v60 = vmul.f32 %v1797_v50, %v1008_v22  ;;  %v1011_v29 = vpop.xlane.xlu2 %1010  ;;  %vm1456_vm14 = vweird.f32 %v1797_v50 }
 0x2fc   : > { %v1448_v13 = vsel %vm1445_vm13, %v1447_v17, %v1443_v58  ;;  %1798 = vrcp.f32 %v1011_v29  ;;  %vm1457_vm0 = vmor %vm1455_vm15, %vm1456_vm14  ;;  %v1476_v30 = vand.u32 2147483648, %v1011_v29  ;;  %v1474_v16 = vand.u32 2147483647, %v1011_v29 }
 0x2fd   : > { %v1449_v24 = vmul.f32 %v2356_v25, %v1448_v13  ;;  %v1452_v27 = vsub.f32 1.0, %v1451_v60  ;;  %vm1470_vm4 = vweird.f32 %v1011_v29 }
 0x2fe   : > { %v1477_v15 = vor.u32 1.1754944e-38, %v1476_v30  ;;  %vm1475_vm6 = vcmp.eq.f32.partialorder %v1474_v16, 8.507059e+37 }
 0x2ff   : > { %1523 = vst.msk [vmem:[%s2257_s19 + $0xe0] sm:$0xff] %vm726_vm2, %v1449_v24  ;;  %v1453_v3 = vmul.f32 %v1797_v50, %v1452_v27 }
 0x301   : > { %v1454_v42 = vadd.f32 %v1797_v50, %v1453_v3 }
 0x302   : > { %v1799_v4 = vpop.eup %1798 }
 0x303   : > { %v1458_v2 = vsel %vm1457_vm0, %v1797_v50, %v1454_v42  ;;  %v1466_v11 = vmul.f32 %v1799_v4, %v1011_v29  ;;  %v1014_v59 = vpop.xlane.xlu0 %1013  ;;  %vm1471_vm3 = vweird.f32 %v1799_v4 }
 0x304   : > { %v1463_v63 = vsel %vm1460_vm1, %v1462_v8, %v1458_v2  ;;  %1800 = vrcp.f32 %v1014_v59  ;;  %vm1472_vm5 = vmor %vm1470_vm4, %vm1471_vm3  ;;  %v1491_v19 = vand.u32 2147483648, %v1014_v59  ;;  %v1489_v12 = vand.u32 2147483647, %v1014_v59 }
 0x305   : > { %v1464_v25 = vmul.f32 %v2361_v46, %v1463_v63  ;;  %v1467_v7 = vsub.f32 1.0, %v1466_v11  ;;  %vm1485_vm8 = vweird.f32 %v1014_v59 }
 0x306   : > { %v1492_v6 = vor.u32 1.1754944e-38, %v1491_v19  ;;  %vm1490_vm10 = vcmp.eq.f32.partialorder %v1489_v12, 8.507059e+37 }
 0x307   : > { %1524 = vst.msk [vmem:[%s2257_s19 + $0xe8] sm:$0xff] %vm726_vm2, %v1464_v25  ;;  %v1468_v56 = vmul.f32 %v1799_v4, %v1467_v7 }
 0x309   : > { %v1469_v18 = vadd.f32 %v1799_v4, %v1468_v56 }
 0x30a   : > { %v1801_v43 = vpop.eup %1800 }
 0x30b   : > { %v1473_v54 = vsel %vm1472_vm5, %v1799_v4, %v1469_v18  ;;  %v1481_v31 = vmul.f32 %v1801_v43, %v1014_v59  ;;  %vm1486_vm7 = vweird.f32 %v1801_v43 }
 0x30c   : > { %v1478_v1 = vsel %vm1475_vm6, %v1477_v15, %v1473_v54  ;;  %vm1487_vm9 = vmor %vm1485_vm8, %vm1486_vm7 }
 0x30d   : > { %v1479_v46 = vmul.f32 %v2366_v61, %v1478_v1  ;;  %v1482_v23 = vsub.f32 1.0, %v1481_v31 }
 0x30f   : > { %1525 = vst.msk [vmem:[%s2257_s19 + $0xf0] sm:$0xff] %vm726_vm2, %v1479_v46  ;;  %v1483_v45 = vmul.f32 %v1801_v43, %v1482_v23 }
 0x311   : > { %v1484_v47 = vadd.f32 %v1801_v43, %v1483_v45 }
 0x313   : > { %v1488_v9 = vsel %vm1487_vm9, %v1801_v43, %v1484_v47 }
 0x314   : > { %v1493_v35 = vsel %vm1490_vm10, %v1492_v6, %v1488_v9 }
 0x315   : > { %v1494_v28 = vmul.f32 %v2376_v38, %v1493_v35 }
 0x317   : > { %1526 = vst.msk [vmem:[%s2257_s19 + $0xf8] sm:$0xff] %vm726_vm2, %v1494_v28 }
 0x318 PF: > { %s15_s18 = sadd.s32 1, %s1808_s18  }
 0x319   : > { %p12_p4 = scmp.ge.s32.totalorder %s15_s18, 4  }
 0x31b   :  { %14 = sbr.rel (!%p12_p4) target bundleno = 1 (0x1), region = 70 }

</bundles_post_ra>
